<compile_context>
chip_gen: v5e
topology: v5e:2x2
jax: 0.10.0
libtpu: 0.0.40
codegen_flags: <defaults>
</compile_context>

<pallas_src>
import functools
import math

import jax
import jax.numpy as jnp
from jax.experimental import pallas as pl
from jax.experimental.pallas import tpu as pltpu


# ------------------------------ Pallas kernel ------------------------------


def _hetero_layer_kernel(xs_ref, w_ref, a_ref, dnorm_ref, o_ref, agg_ref, *,
                         num_divisions, apply_relu):
    """One (row-tile, source-tile) grid step of a fused HeteroGCN layer.

    xs_ref:    (TN, F)      bf16  source features pre-scaled by the node norm
    w_ref:     (D, F, C)    f32   merge-folded per-division weights (C % 128 == 0)
    a_ref:     (D, TR, TN)  int8  per-division 0/1 adjacency block
    dnorm_ref: (TR, 1)      f32   destination-node norm
    o_ref:     (TR, C)      f32   output block (resident across the k axis)
    agg_ref:   (D, TR, F)   f32   VMEM scratch: per-division aggregates
    """
    k = pl.program_id(1)

    @pl.when(k == 0)
    def _init():
        agg_ref[...] = jnp.zeros_like(agg_ref)

    # Head-independent aggregation: agg_d += A_d[:, k-tile] @ xs[k-tile].
    # int8 adjacency is upcast to bf16 in-register (exact 0/1); f32 accumulate.
    x_tile = xs_ref[...]
    for d in range(num_divisions):
        agg_ref[d] = agg_ref[d] + jnp.dot(
            a_ref[d].astype(jnp.bfloat16), x_tile,
            preferred_element_type=jnp.float32)

    @pl.when(k == pl.num_programs(1) - 1)
    def _finalize():
        # Per-division projection accumulated directly into the (VMEM-resident)
        # output block; operands stay f32 (tiny matmuls, better accuracy).
        o_ref[...] = jnp.dot(agg_ref[0], w_ref[0],
                             preferred_element_type=jnp.float32)
        for d in range(1, num_divisions):
            o_ref[...] = o_ref[...] + jnp.dot(
                agg_ref[d], w_ref[d], preferred_element_type=jnp.float32)
        h = o_ref[...] * dnorm_ref[...]
        if apply_relu:
            h = jnp.maximum(h, 0.0)
        o_ref[...] = h


# ------------------------------ layer wrapper ------------------------------


def hetero_gcn_layer(xs, w_packed, adj_i8, norm, *, apply_relu, tr, tn,
                     vmem_limit):
    """One HeteroGCN layer on padded inputs.

    xs:       (N_pad, F)        bf16  features already scaled by the node norm
    w_packed: (D, F, C)         f32   merge-folded weights, C multiple of 128
    adj_i8:   (D, N_pad, N_pad) int8  0/1 adjacency
    norm:     (N_pad, 1)        f32
    """
    n_pad, nf = xs.shape
    nd, nf2, nc = w_packed.shape
    assert nf == nf2, (nf, nf2)
    assert n_pad % tr == 0 and n_pad % tn == 0 and nc % 128 == 0

    return pl.pallas_call(
        functools.partial(_hetero_layer_kernel, num_divisions=nd,
                          apply_relu=apply_relu),
        out_shape=jax.ShapeDtypeStruct((n_pad, nc), jnp.float32),
        grid_spec=pltpu.PrefetchScalarGridSpec(
            num_scalar_prefetch=0,
            grid=(n_pad // tr, n_pad // tn),
            in_specs=[
                pl.BlockSpec((tn, nf), lambda r, k: (k, 0)),
                pl.BlockSpec((nd, nf, nc), lambda r, k: (0, 0, 0)),
                pl.BlockSpec((nd, tr, tn), lambda r, k: (0, r, k)),
                pl.BlockSpec((tr, 1), lambda r, k: (r, 0)),
            ],
            out_specs=pl.BlockSpec((tr, nc), lambda r, k: (r, 0)),
            scratch_shapes=[pltpu.VMEM((nd, tr, nf), jnp.float32)],
        ),
        compiler_params=pltpu.CompilerParams(
            dimension_semantics=("parallel", "arbitrary"),
            vmem_limit_bytes=vmem_limit),
    )(xs, w_packed, adj_i8, norm)


def hetero_gcn_net(features, w1_packed, w2_packed, adj_i8, norm_pad, *,
                   n_nodes, num_classes, tr, tn, vmem_limit):
    """HeteroGCNNet forward: layer1 (ReLU, cat/cat) -> layer2 (identity, mean/mean)."""
    # TODO(synk): dropout is identity (eval-mode forward).
    n_pad = adj_i8.shape[1]
    x = jnp.pad(features, ((0, n_pad - n_nodes), (0, 0)))
    xs1 = (x * norm_pad).astype(jnp.bfloat16)          # fold source norm once
    h = hetero_gcn_layer(xs1, w1_packed, adj_i8, norm_pad, apply_relu=True,
                         tr=tr, tn=tn, vmem_limit=vmem_limit)
    xs2 = (h * norm_pad).astype(jnp.bfloat16)
    out = hetero_gcn_layer(xs2, w2_packed, adj_i8, norm_pad, apply_relu=False,
                           tr=tr, tn=tn, vmem_limit=vmem_limit)
    return out[:n_nodes, :num_classes]


# --------------------- one-time preprocessing (outside jit) ---------------------


def _round_up(x, m):
    return ((x + m - 1) // m) * m


def _chip_config():
    """Chip-aware VMEM budget and tile targets (fallback = v7x-safe)."""
    vmem_cap = None
    try:
        info = pltpu.get_tpu_info()
        vmem_cap = getattr(info, "vmem_capacity_bytes", None)
    except Exception:
        vmem_cap = None
    if vmem_cap is None:
        vmem_cap = 64 * 1024 * 1024
    if vmem_cap >= 96 * 1024 * 1024:
        # v5e / v6e: 128 MiB physical VMEM -> bigger row tiles, higher limit.
        return {"vmem_limit": 96 * 1024 * 1024, "tr": 512, "tn": 4096}
    # v7x: 64 MiB physical VMEM -> keep headroom, smaller row tiles so the
    # 'parallel' row axis shards across the two TensorCores.
    return {"vmem_limit": 48 * 1024 * 1024, "tr": 256, "tn": 4096}


def _pad_and_tiles(n, tr_target, tn_target):
    """Zero-pad the node count so row/source tiles divide it exactly."""
    tr = min(tr_target, _round_up(n, 128))
    n_pad = _round_up(n, tr)
    m = n_pad // tr
    tn = tr
    for q in range(m, 0, -1):            # largest multiple of tr dividing n_pad
        cand = q * tr
        if cand <= tn_target and m % q == 0:
            tn = cand
            break
    return n_pad, tr, tn


def pack_cat_cat_weights(head_weights):
    """ggcn 'cat' + channel 'cat': disjoint zero-padded column groups.

    head_weights: list (len NH) of (D, F, H).  Returns ((D, F, C_pad), C_true)
    with W_{h,d} in columns [(h*D+d)*H, (h*D+d+1)*H)  (matches torch cat order).
    """
    w = jnp.stack(head_weights).astype(jnp.float32)         # (NH, D, F, H)
    nh, nd, nf, h = w.shape
    eye = jnp.eye(nd, dtype=jnp.float32)
    wb = jnp.einsum("hdfo,de->dfheo", w, eye).reshape(nd, nf, nh * nd * h)
    c_true = nh * nd * h
    c_pad = _round_up(c_true, 128)
    if c_pad > c_true:
        wb = jnp.pad(wb, ((0, 0), (0, 0), (0, c_pad - c_true)))
    return wb, c_true


def pack_mean_mean_weights(head_weights, *, ggcn_merge, channel_merge):
    """ggcn/channel merge in {'mean','sum'} with IDENTITY activation: fold the
    head reduction and the division-mean scale into one (F, H) slab per
    division, zero-padded to >=128 output lanes (lane-dense stores)."""
    w = jnp.stack(head_weights).astype(jnp.float32)         # (NH, D, F, H)
    nh, nd, nf, h = w.shape
    w_eff = jnp.sum(w, axis=0)                              # (D, F, H)
    if channel_merge == "mean":
        w_eff = w_eff / nh
    if ggcn_merge == "mean":
        w_eff = w_eff / nd
    c_pad = _round_up(h, 128)
    if c_pad > h:
        w_eff = jnp.pad(w_eff, ((0, 0), (0, 0), (0, c_pad - h)))
    return w_eff, h


def _pad_in_feats(w_packed, in_feats_pad):
    """Pad the input-feature axis with zero rows (previous layer may emit a
    lane-padded slab whose extra columns are exactly zero)."""
    nd, nf, nc = w_packed.shape
    if in_feats_pad > nf:
        w_packed = jnp.pad(w_packed, ((0, 0), (0, in_feats_pad - nf), (0, 0)))
    return w_packed


# ------------------------------ reference & setup ------------------------------


def _xavier_uniform(key, shape, fan_in, fan_out):
    lim = (6.0 / (fan_in + fan_out)) ** 0.5
    return jax.random.uniform(key, shape, jnp.float32, -lim, lim)


def _reference_net(x, l1_ws, l2_ws, adj, norm):
    """Pure-JAX f32 forward mirroring the PyTorch module (sanity check)."""
    def layer(feat, head_ws, ggcn_merge, channel_merge, act):
        outs = []
        for w_stack in head_ws:
            res = []
            for d in range(adj.shape[0]):
                wh = (feat @ w_stack[d]) * norm
                res.append(adj[d] @ wh)
            if ggcn_merge == "sum":
                h = sum(res)
            elif ggcn_merge == "cat":
                h = jnp.concatenate(res, axis=-1)
            else:
                h = sum(res) / len(res)
            outs.append(act(h * norm))
        if channel_merge == "cat":
            return jnp.concatenate(outs, axis=1)
        return jnp.mean(jnp.stack(outs, axis=0), axis=0)

    h = layer(x, l1_ws, "cat", "cat", jax.nn.relu)
    return layer(h, l2_ws, "mean", "mean", lambda v: v)


if __name__ == "__main__":
    # Small deterministic configuration (mirrors HeteroGCNNet's constructor).
    N = 16                      # number of graph nodes
    F_IN = 8                    # num_input_features
    HID = 32                    # num_hidden
    NCLS = 8                    # num_output_classes
    NDIV = 2                    # num_divisions
    NH1 = 2                     # num_heads_layer_one
    NH2 = 1                     # num_heads_layer_two
    L2_IN = HID * NDIV * NH1    # layer-2 in_feats = 32 * 2 * 2 = 128

    key = jax.random.PRNGKey(0)
    k_feat, k_w = jax.random.split(key)

    # Deterministic synthetic graph: node i -> (i+1)%N and (i+3)%N; divisions
    # assigned round-robin by edge id.  adj[d, v, u] = 1 for edge u->v in div d.
    src, dst, sub = [], [], []
    eid = 0
    for i in range(N):
        for off in (1, 3):
            src.append(i)
            dst.append((i + off) % N)
            sub.append(eid % NDIV)
            eid += 1
    adj = jnp.zeros((NDIV, N, N), jnp.float32)
    adj = adj.at[jnp.array(sub), jnp.array(dst), jnp.array(src)].set(1.0)

    # Per-node norm (GCN-style: 1/sqrt(1 + in_degree)).
    in_deg = jnp.sum(adj, axis=(0, 2)).reshape(N, 1)
    norm = (1.0 / jnp.sqrt(1.0 + in_deg)).astype(jnp.float32)

    # Deterministic Xavier-uniform weights (nn.Linear(in, out, bias=False)),
    # stored pre-transposed as (D, in, out).
    wkeys = jax.random.split(k_w, NH1 + NH2)
    layer1_ws = [_xavier_uniform(wkeys[h], (NDIV, F_IN, HID), F_IN, HID)
                 for h in range(NH1)]
    layer2_ws = [_xavier_uniform(wkeys[NH1 + h], (NDIV, L2_IN, NCLS), L2_IN, NCLS)
                 for h in range(NH2)]

    features = jax.random.normal(k_feat, (N, F_IN), jnp.float32)

    # ---- one-time (per graph / per params) preprocessing, outside jit ----
    cfg = _chip_config()
    N_PAD, TR, TN = _pad_and_tiles(N, cfg["tr"], cfg["tn"])

    # Adjacency stored once in its kernel dtype (int8, exact 0/1), zero-padded.
    adj_i8 = jnp.pad(adj, ((0, 0), (0, N_PAD - N), (0, N_PAD - N))).astype(jnp.int8)
    norm_pad = jnp.pad(norm, ((0, N_PAD - N), (0, 0)))

    w1_packed, c1_true = pack_cat_cat_weights(layer1_ws)
    assert c1_true == L2_IN
    w2_packed, _ = pack_mean_mean_weights(layer2_ws, ggcn_merge="mean",
                                          channel_merge="mean")
    w2_packed = _pad_in_feats(w2_packed, w1_packed.shape[-1])

    fwd = jax.jit(functools.partial(
        hetero_gcn_net, n_nodes=N, num_classes=NCLS, tr=TR, tn=TN,
        vmem_limit=cfg["vmem_limit"]))
    out = jax.block_until_ready(
        fwd(features, w1_packed, w2_packed, adj_i8, norm_pad))

    assert out.shape == (N, NCLS), out.shape
    assert out.dtype == jnp.float32

    # Loose tolerance: the A matmuls run with bf16 operands (f32 accumulation);
    # the only per-layer low-precision rounding is the xs -> bf16 cast.
    ref = _reference_net(features, layer1_ws, layer2_ws, adj, norm)
    max_err = float(jnp.max(jnp.abs(out - ref)))
    assert max_err < 1e-1, f"mismatch vs reference: {max_err}"

    print("KERNEL_OK")
</pallas_src>

<mosaic_0001>
module attributes {stable_mosaic.version = 11 : i64} {
  func.func @_hetero_layer_kernel(%arg0: i32, %arg1: i32, %arg2: memref<128x8xbf16, #tpu.memory_space<vmem>>, %arg3: memref<2x8x128xf32, #tpu.memory_space<vmem>>, %arg4: memref<2x128x128xi8, #tpu.memory_space<vmem>>, %arg5: memref<128x1xf32, #tpu.memory_space<vmem>>, %arg6: memref<128x128xf32, #tpu.memory_space<vmem>>, %arg7: memref<2x128x8xf32, #tpu.memory_space<vmem>>) attributes {dimension_semantics = [#tpu.dimension_semantics<parallel>, #tpu.dimension_semantics<arbitrary>], iteration_bounds = array<i64: 1, 1>, scalar_prefetch = 0 : i64, scratch_operands = 1 : i64, tpu.core_type = #tpu.core_type<tc>, window_params = [{transform_indices = @transform_0, window_bounds = array<i64: 128, 8>}, {pipeline_mode = #tpu.pipeline_mode<synchronous>, transform_indices = @transform_1, window_bounds = array<i64: 2, 8, 128>}, {transform_indices = @transform_2, window_bounds = array<i64: 2, 128, 128>}, {transform_indices = @transform_3, window_bounds = array<i64: 128, 1>}, {transform_indices = @transform_4, window_bounds = array<i64: 128, 128>}]} {
    %c0_i32 = arith.constant 0 : i32
    %0 = arith.cmpi eq, %arg1, %c0_i32 : i32
    %1 = arith.extui %0 : i1 to i32
    %c0_i32_0 = arith.constant 0 : i32
    %2 = arith.cmpi ne, %1, %c0_i32_0 : i32
    scf.if %2 {
      %cst_22 = arith.constant 0.000000e+00 : f32
      %27 = vector.broadcast %cst_22 : f32 to vector<2x128x8xf32>
      %c0_23 = arith.constant 0 : index
      %c0_24 = arith.constant 0 : index
      %c0_25 = arith.constant 0 : index
      %28 = vector.load %arg7[%c0_23, %c0_24, %c0_25] : memref<2x128x8xf32, #tpu.memory_space<vmem>>, vector<2x128x8xf32>
      tpu.vector_store %arg7[%c0_23, %c0_24, %c0_25], %27 {strides = array<i32>} : memref<2x128x8xf32, #tpu.memory_space<vmem>>, vector<2x128x8xf32>,
    } else {
    }
    %c0 = arith.constant 0 : index
    %c0_1 = arith.constant 0 : index
    %3 = vector.load %arg2[%c0, %c0_1] : memref<128x8xbf16, #tpu.memory_space<vmem>>, vector<128x8xbf16>
    %c0_2 = arith.constant 0 : index
    %c0_3 = arith.constant 0 : index
    %c0_4 = arith.constant 0 : index
    %4 = vector.load %arg7[%c0_2, %c0_3, %c0_4] : memref<2x128x8xf32, #tpu.memory_space<vmem>>, vector<1x128x8xf32>
    %5 = vector.shape_cast %4 : vector<1x128x8xf32> to vector<128x8xf32>
    %c0_5 = arith.constant 0 : index
    %c0_6 = arith.constant 0 : index
    %c0_7 = arith.constant 0 : index
    %6 = vector.load %arg4[%c0_5, %c0_6, %c0_7] : memref<2x128x128xi8, #tpu.memory_space<vmem>>, vector<1x128x128xi8>
    %7 = vector.shape_cast %6 : vector<1x128x128xi8> to vector<128x128xi8>
    %8 = arith.sitofp %7 : vector<128x128xi8> to vector<128x128xbf16>
    %cst = arith.constant dense<0.000000e+00> : vector<128x8xf32>
    %9 = tpu.matmul %8, %3, %cst {dimension_numbers = #tpu.dot_dimension_numbers<[1], [0], [0], [1], [0, 0, 1, 1], [], []>} : vector<128x128xbf16>, vector<128x8xbf16>, vector<128x8xf32> -> vector<128x8xf32>
    %10 = arith.addf %5, %9 : vector<128x8xf32>
    %c0_8 = arith.constant 0 : index
    %c0_9 = arith.constant 0 : index
    %c0_10 = arith.constant 0 : index
    %11 = vector.load %arg7[%c0_8, %c0_9, %c0_10] : memref<2x128x8xf32, #tpu.memory_space<vmem>>, vector<1x128x8xf32>
    %12 = vector.shape_cast %11 : vector<1x128x8xf32> to vector<128x8xf32>
    %13 = vector.shape_cast %10 : vector<128x8xf32> to vector<1x128x8xf32>
    tpu.vector_store %arg7[%c0_8, %c0_9, %c0_10], %13 {strides = array<i32>} : memref<2x128x8xf32, #tpu.memory_space<vmem>>, vector<1x128x8xf32>,
    %c1 = arith.constant 1 : index
    %c0_11 = arith.constant 0 : index
    %c0_12 = arith.constant 0 : index
    %14 = vector.load %arg7[%c1, %c0_11, %c0_12] : memref<2x128x8xf32, #tpu.memory_space<vmem>>, vector<1x128x8xf32>
    %15 = vector.shape_cast %14 : vector<1x128x8xf32> to vector<128x8xf32>
    %c1_13 = arith.constant 1 : index
    %c0_14 = arith.constant 0 : index
    %c0_15 = arith.constant 0 : index
    %16 = vector.load %arg4[%c1_13, %c0_14, %c0_15] : memref<2x128x128xi8, #tpu.memory_space<vmem>>, vector<1x128x128xi8>
    %17 = vector.shape_cast %16 : vector<1x128x128xi8> to vector<128x128xi8>
    %18 = arith.sitofp %17 : vector<128x128xi8> to vector<128x128xbf16>
    %cst_16 = arith.constant dense<0.000000e+00> : vector<128x8xf32>
    %19 = tpu.matmul %18, %3, %cst_16 {dimension_numbers = #tpu.dot_dimension_numbers<[1], [0], [0], [1], [0, 0, 1, 1], [], []>} : vector<128x128xbf16>, vector<128x8xbf16>, vector<128x8xf32> -> vector<128x8xf32>
    %20 = arith.addf %15, %19 : vector<128x8xf32>
    %c1_17 = arith.constant 1 : index
    %c0_18 = arith.constant 0 : index
    %c0_19 = arith.constant 0 : index
    %21 = vector.load %arg7[%c1_17, %c0_18, %c0_19] : memref<2x128x8xf32, #tpu.memory_space<vmem>>, vector<1x128x8xf32>
    %22 = vector.shape_cast %21 : vector<1x128x8xf32> to vector<128x8xf32>
    %23 = vector.shape_cast %20 : vector<128x8xf32> to vector<1x128x8xf32>
    tpu.vector_store %arg7[%c1_17, %c0_18, %c0_19], %23 {strides = array<i32>} : memref<2x128x8xf32, #tpu.memory_space<vmem>>, vector<1x128x8xf32>,
    %c0_i32_20 = arith.constant 0 : i32
    %24 = arith.cmpi eq, %arg1, %c0_i32_20 : i32
    %25 = arith.extui %24 : i1 to i32
    %c0_i32_21 = arith.constant 0 : i32
    %26 = arith.cmpi ne, %25, %c0_i32_21 : i32
    scf.if %26 {
      %c0_22 = arith.constant 0 : index
      %c0_23 = arith.constant 0 : index
      %c0_24 = arith.constant 0 : index
      %27 = vector.load %arg7[%c0_22, %c0_23, %c0_24] : memref<2x128x8xf32, #tpu.memory_space<vmem>>, vector<1x128x8xf32>
      %28 = vector.shape_cast %27 : vector<1x128x8xf32> to vector<128x8xf32>
      %c0_25 = arith.constant 0 : index
      %c0_26 = arith.constant 0 : index
      %c0_27 = arith.constant 0 : index
      %29 = vector.load %arg3[%c0_25, %c0_26, %c0_27] : memref<2x8x128xf32, #tpu.memory_space<vmem>>, vector<1x8x128xf32>
      %30 = vector.shape_cast %29 : vector<1x8x128xf32> to vector<8x128xf32>
      %cst_28 = arith.constant dense<0.000000e+00> : vector<128x128xf32>
      %31 = tpu.matmul %28, %30, %cst_28 {dimension_numbers = #tpu.dot_dimension_numbers<[1], [0], [0], [1], [0, 0, 1, 1], [], []>} : vector<128x8xf32>, vector<8x128xf32>, vector<128x128xf32> -> vector<128x128xf32>
      %c0_29 = arith.constant 0 : index
      %c0_30 = arith.constant 0 : index
      %32 = vector.load %arg6[%c0_29, %c0_30] : memref<128x128xf32, #tpu.memory_space<vmem>>, vector<128x128xf32>
      tpu.vector_store %arg6[%c0_29, %c0_30], %31 {strides = array<i32>} : memref<128x128xf32, #tpu.memory_space<vmem>>, vector<128x128xf32>,
      %c0_31 = arith.constant 0 : index
      %c0_32 = arith.constant 0 : index
      %33 = vector.load %arg6[%c0_31, %c0_32] : memref<128x128xf32, #tpu.memory_space<vmem>>, vector<128x128xf32>
      %c1_33 = arith.constant 1 : index
      %c0_34 = arith.constant 0 : index
      %c0_35 = arith.constant 0 : index
      %34 = vector.load %arg7[%c1_33, %c0_34, %c0_35] : memref<2x128x8xf32, #tpu.memory_space<vmem>>, vector<1x128x8xf32>
      %35 = vector.shape_cast %34 : vector<1x128x8xf32> to vector<128x8xf32>
      %c1_36 = arith.constant 1 : index
      %c0_37 = arith.constant 0 : index
      %c0_38 = arith.constant 0 : index
      %36 = vector.load %arg3[%c1_36, %c0_37, %c0_38] : memref<2x8x128xf32, #tpu.memory_space<vmem>>, vector<1x8x128xf32>
      %37 = vector.shape_cast %36 : vector<1x8x128xf32> to vector<8x128xf32>
      %cst_39 = arith.constant dense<0.000000e+00> : vector<128x128xf32>
      %38 = tpu.matmul %35, %37, %cst_39 {dimension_numbers = #tpu.dot_dimension_numbers<[1], [0], [0], [1], [0, 0, 1, 1], [], []>} : vector<128x8xf32>, vector<8x128xf32>, vector<128x128xf32> -> vector<128x128xf32>
      %39 = arith.addf %33, %38 : vector<128x128xf32>
      %c0_40 = arith.constant 0 : index
      %c0_41 = arith.constant 0 : index
      %40 = vector.load %arg6[%c0_40, %c0_41] : memref<128x128xf32, #tpu.memory_space<vmem>>, vector<128x128xf32>
      tpu.vector_store %arg6[%c0_40, %c0_41], %39 {strides = array<i32>} : memref<128x128xf32, #tpu.memory_space<vmem>>, vector<128x128xf32>,
      %c0_42 = arith.constant 0 : index
      %c0_43 = arith.constant 0 : index
      %41 = vector.load %arg6[%c0_42, %c0_43] : memref<128x128xf32, #tpu.memory_space<vmem>>, vector<128x128xf32>
      %c0_44 = arith.constant 0 : index
      %c0_45 = arith.constant 0 : index
      %42 = vector.load %arg5[%c0_44, %c0_45] : memref<128x1xf32, #tpu.memory_space<vmem>>, vector<128x1xf32>
      %43 = vector.broadcast %42 : vector<128x1xf32> to vector<128x128xf32>
      %44 = arith.mulf %41, %43 : vector<128x128xf32>
      %cst_46 = arith.constant 0.000000e+00 : f32
      %45 = vector.broadcast %cst_46 : f32 to vector<128x128xf32>
      %46 = arith.maximumf %44, %45 : vector<128x128xf32>
      %c0_47 = arith.constant 0 : index
      %c0_48 = arith.constant 0 : index
      %47 = vector.load %arg6[%c0_47, %c0_48] : memref<128x128xf32, #tpu.memory_space<vmem>>, vector<128x128xf32>
      tpu.vector_store %arg6[%c0_47, %c0_48], %46 {strides = array<i32>} : memref<128x128xf32, #tpu.memory_space<vmem>>, vector<128x128xf32>,
    } else {
    }
    return
  }
  func.func @transform_0(%arg0: i32, %arg1: i32) -> (i32, i32) {
    %c0_i32 = arith.constant 0 : i32
    %c0_i32_0 = arith.constant 0 : i32
    return %arg1, %c0_i32 : i32, i32
  }
  func.func @transform_1(%arg0: i32, %arg1: i32) -> (i32, i32, i32) {
    %c0_i32 = arith.constant 0 : i32
    %c0_i32_0 = arith.constant 0 : i32
    %c0_i32_1 = arith.constant 0 : i32
    %c0_i32_2 = arith.constant 0 : i32
    return %c0_i32, %c0_i32_0, %c0_i32_1 : i32, i32, i32
  }
  func.func @transform_2(%arg0: i32, %arg1: i32) -> (i32, i32, i32) {
    %c0_i32 = arith.constant 0 : i32
    %c0_i32_0 = arith.constant 0 : i32
    return %c0_i32, %arg0, %arg1 : i32, i32, i32
  }
  func.func @transform_3(%arg0: i32, %arg1: i32) -> (i32, i32) {
    %c0_i32 = arith.constant 0 : i32
    %c0_i32_0 = arith.constant 0 : i32
    return %arg0, %c0_i32 : i32, i32
  }
  func.func @transform_4(%arg0: i32, %arg1: i32) -> (i32, i32) {
    %c0_i32 = arith.constant 0 : i32
    %c0_i32_0 = arith.constant 0 : i32
    return %arg0, %c0_i32 : i32, i32
  }
}

module attributes {stable_mosaic.version = 11 : i64} {
  func.func @_hetero_layer_kernel(%arg0: i32, %arg1: i32, %arg2: memref<128x128xbf16, #tpu.memory_space<vmem>>, %arg3: memref<2x128x128xf32, #tpu.memory_space<vmem>>, %arg4: memref<2x128x128xi8, #tpu.memory_space<vmem>>, %arg5: memref<128x1xf32, #tpu.memory_space<vmem>>, %arg6: memref<128x128xf32, #tpu.memory_space<vmem>>, %arg7: memref<2x128x128xf32, #tpu.memory_space<vmem>>) attributes {dimension_semantics = [#tpu.dimension_semantics<parallel>, #tpu.dimension_semantics<arbitrary>], iteration_bounds = array<i64: 1, 1>, scalar_prefetch = 0 : i64, scratch_operands = 1 : i64, tpu.core_type = #tpu.core_type<tc>, window_params = [{transform_indices = @transform_0, window_bounds = array<i64: 128, 128>}, {pipeline_mode = #tpu.pipeline_mode<synchronous>, transform_indices = @transform_1, window_bounds = array<i64: 2, 128, 128>}, {transform_indices = @transform_2, window_bounds = array<i64: 2, 128, 128>}, {transform_indices = @transform_3, window_bounds = array<i64: 128, 1>}, {transform_indices = @transform_4, window_bounds = array<i64: 128, 128>}]} {
    %c0_i32 = arith.constant 0 : i32
    %0 = arith.cmpi eq, %arg1, %c0_i32 : i32
    %1 = arith.extui %0 : i1 to i32
    %c0_i32_0 = arith.constant 0 : i32
    %2 = arith.cmpi ne, %1, %c0_i32_0 : i32
    scf.if %2 {
      %cst_22 = arith.constant 0.000000e+00 : f32
      %27 = vector.broadcast %cst_22 : f32 to vector<2x128x128xf32>
      %c0_23 = arith.constant 0 : index
      %c0_24 = arith.constant 0 : index
      %c0_25 = arith.constant 0 : index
      %28 = vector.load %arg7[%c0_23, %c0_24, %c0_25] : memref<2x128x128xf32, #tpu.memory_space<vmem>>, vector<2x128x128xf32>
      tpu.vector_store %arg7[%c0_23, %c0_24, %c0_25], %27 {strides = array<i32>} : memref<2x128x128xf32, #tpu.memory_space<vmem>>, vector<2x128x128xf32>,
    } else {
    }
    %c0 = arith.constant 0 : index
    %c0_1 = arith.constant 0 : index
    %3 = vector.load %arg2[%c0, %c0_1] : memref<128x128xbf16, #tpu.memory_space<vmem>>, vector<128x128xbf16>
    %c0_2 = arith.constant 0 : index
    %c0_3 = arith.constant 0 : index
    %c0_4 = arith.constant 0 : index
    %4 = vector.load %arg7[%c0_2, %c0_3, %c0_4] : memref<2x128x128xf32, #tpu.memory_space<vmem>>, vector<1x128x128xf32>
    %5 = vector.shape_cast %4 : vector<1x128x128xf32> to vector<128x128xf32>
    %c0_5 = arith.constant 0 : index
    %c0_6 = arith.constant 0 : index
    %c0_7 = arith.constant 0 : index
    %6 = vector.load %arg4[%c0_5, %c0_6, %c0_7] : memref<2x128x128xi8, #tpu.memory_space<vmem>>, vector<1x128x128xi8>
    %7 = vector.shape_cast %6 : vector<1x128x128xi8> to vector<128x128xi8>
    %8 = arith.sitofp %7 : vector<128x128xi8> to vector<128x128xbf16>
    %cst = arith.constant dense<0.000000e+00> : vector<128x128xf32>
    %9 = tpu.matmul %8, %3, %cst {dimension_numbers = #tpu.dot_dimension_numbers<[1], [0], [0], [1], [0, 0, 1, 1], [], []>} : vector<128x128xbf16>, vector<128x128xbf16>, vector<128x128xf32> -> vector<128x128xf32>
    %10 = arith.addf %5, %9 : vector<128x128xf32>
    %c0_8 = arith.constant 0 : index
    %c0_9 = arith.constant 0 : index
    %c0_10 = arith.constant 0 : index
    %11 = vector.load %arg7[%c0_8, %c0_9, %c0_10] : memref<2x128x128xf32, #tpu.memory_space<vmem>>, vector<1x128x128xf32>
    %12 = vector.shape_cast %11 : vector<1x128x128xf32> to vector<128x128xf32>
    %13 = vector.shape_cast %10 : vector<128x128xf32> to vector<1x128x128xf32>
    tpu.vector_store %arg7[%c0_8, %c0_9, %c0_10], %13 {strides = array<i32>} : memref<2x128x128xf32, #tpu.memory_space<vmem>>, vector<1x128x128xf32>,
    %c1 = arith.constant 1 : index
    %c0_11 = arith.constant 0 : index
    %c0_12 = arith.constant 0 : index
    %14 = vector.load %arg7[%c1, %c0_11, %c0_12] : memref<2x128x128xf32, #tpu.memory_space<vmem>>, vector<1x128x128xf32>
    %15 = vector.shape_cast %14 : vector<1x128x128xf32> to vector<128x128xf32>
    %c1_13 = arith.constant 1 : index
    %c0_14 = arith.constant 0 : index
    %c0_15 = arith.constant 0 : index
    %16 = vector.load %arg4[%c1_13, %c0_14, %c0_15] : memref<2x128x128xi8, #tpu.memory_space<vmem>>, vector<1x128x128xi8>
    %17 = vector.shape_cast %16 : vector<1x128x128xi8> to vector<128x128xi8>
    %18 = arith.sitofp %17 : vector<128x128xi8> to vector<128x128xbf16>
    %cst_16 = arith.constant dense<0.000000e+00> : vector<128x128xf32>
    %19 = tpu.matmul %18, %3, %cst_16 {dimension_numbers = #tpu.dot_dimension_numbers<[1], [0], [0], [1], [0, 0, 1, 1], [], []>} : vector<128x128xbf16>, vector<128x128xbf16>, vector<128x128xf32> -> vector<128x128xf32>
    %20 = arith.addf %15, %19 : vector<128x128xf32>
    %c1_17 = arith.constant 1 : index
    %c0_18 = arith.constant 0 : index
    %c0_19 = arith.constant 0 : index
    %21 = vector.load %arg7[%c1_17, %c0_18, %c0_19] : memref<2x128x128xf32, #tpu.memory_space<vmem>>, vector<1x128x128xf32>
    %22 = vector.shape_cast %21 : vector<1x128x128xf32> to vector<128x128xf32>
    %23 = vector.shape_cast %20 : vector<128x128xf32> to vector<1x128x128xf32>
    tpu.vector_store %arg7[%c1_17, %c0_18, %c0_19], %23 {strides = array<i32>} : memref<2x128x128xf32, #tpu.memory_space<vmem>>, vector<1x128x128xf32>,
    %c0_i32_20 = arith.constant 0 : i32
    %24 = arith.cmpi eq, %arg1, %c0_i32_20 : i32
    %25 = arith.extui %24 : i1 to i32
    %c0_i32_21 = arith.constant 0 : i32
    %26 = arith.cmpi ne, %25, %c0_i32_21 : i32
    scf.if %26 {
      %c0_22 = arith.constant 0 : index
      %c0_23 = arith.constant 0 : index
      %c0_24 = arith.constant 0 : index
      %27 = vector.load %arg7[%c0_22, %c0_23, %c0_24] : memref<2x128x128xf32, #tpu.memory_space<vmem>>, vector<1x128x128xf32>
      %28 = vector.shape_cast %27 : vector<1x128x128xf32> to vector<128x128xf32>
      %c0_25 = arith.constant 0 : index
      %c0_26 = arith.constant 0 : index
      %c0_27 = arith.constant 0 : index
      %29 = vector.load %arg3[%c0_25, %c0_26, %c0_27] : memref<2x128x128xf32, #tpu.memory_space<vmem>>, vector<1x128x128xf32>
      %30 = vector.shape_cast %29 : vector<1x128x128xf32> to vector<128x128xf32>
      %cst_28 = arith.constant dense<0.000000e+00> : vector<128x128xf32>
      %31 = tpu.matmul %28, %30, %cst_28 {dimension_numbers = #tpu.dot_dimension_numbers<[1], [0], [0], [1], [0, 0, 1, 1], [], []>} : vector<128x128xf32>, vector<128x128xf32>, vector<128x128xf32> -> vector<128x128xf32>
      %c0_29 = arith.constant 0 : index
      %c0_30 = arith.constant 0 : index
      %32 = vector.load %arg6[%c0_29, %c0_30] : memref<128x128xf32, #tpu.memory_space<vmem>>, vector<128x128xf32>
      tpu.vector_store %arg6[%c0_29, %c0_30], %31 {strides = array<i32>} : memref<128x128xf32, #tpu.memory_space<vmem>>, vector<128x128xf32>,
      %c0_31 = arith.constant 0 : index
      %c0_32 = arith.constant 0 : index
      %33 = vector.load %arg6[%c0_31, %c0_32] : memref<128x128xf32, #tpu.memory_space<vmem>>, vector<128x128xf32>
      %c1_33 = arith.constant 1 : index
      %c0_34 = arith.constant 0 : index
      %c0_35 = arith.constant 0 : index
      %34 = vector.load %arg7[%c1_33, %c0_34, %c0_35] : memref<2x128x128xf32, #tpu.memory_space<vmem>>, vector<1x128x128xf32>
      %35 = vector.shape_cast %34 : vector<1x128x128xf32> to vector<128x128xf32>
      %c1_36 = arith.constant 1 : index
      %c0_37 = arith.constant 0 : index
      %c0_38 = arith.constant 0 : index
      %36 = vector.load %arg3[%c1_36, %c0_37, %c0_38] : memref<2x128x128xf32, #tpu.memory_space<vmem>>, vector<1x128x128xf32>
      %37 = vector.shape_cast %36 : vector<1x128x128xf32> to vector<128x128xf32>
      %cst_39 = arith.constant dense<0.000000e+00> : vector<128x128xf32>
      %38 = tpu.matmul %35, %37, %cst_39 {dimension_numbers = #tpu.dot_dimension_numbers<[1], [0], [0], [1], [0, 0, 1, 1], [], []>} : vector<128x128xf32>, vector<128x128xf32>, vector<128x128xf32> -> vector<128x128xf32>
      %39 = arith.addf %33, %38 : vector<128x128xf32>
      %c0_40 = arith.constant 0 : index
      %c0_41 = arith.constant 0 : index
      %40 = vector.load %arg6[%c0_40, %c0_41] : memref<128x128xf32, #tpu.memory_space<vmem>>, vector<128x128xf32>
      tpu.vector_store %arg6[%c0_40, %c0_41], %39 {strides = array<i32>} : memref<128x128xf32, #tpu.memory_space<vmem>>, vector<128x128xf32>,
      %c0_42 = arith.constant 0 : index
      %c0_43 = arith.constant 0 : index
      %41 = vector.load %arg6[%c0_42, %c0_43] : memref<128x128xf32, #tpu.memory_space<vmem>>, vector<128x128xf32>
      %c0_44 = arith.constant 0 : index
      %c0_45 = arith.constant 0 : index
      %42 = vector.load %arg5[%c0_44, %c0_45] : memref<128x1xf32, #tpu.memory_space<vmem>>, vector<128x1xf32>
      %43 = vector.broadcast %42 : vector<128x1xf32> to vector<128x128xf32>
      %44 = arith.mulf %41, %43 : vector<128x128xf32>
      %c0_46 = arith.constant 0 : index
      %c0_47 = arith.constant 0 : index
      %45 = vector.load %arg6[%c0_46, %c0_47] : memref<128x128xf32, #tpu.memory_space<vmem>>, vector<128x128xf32>
      tpu.vector_store %arg6[%c0_46, %c0_47], %44 {strides = array<i32>} : memref<128x128xf32, #tpu.memory_space<vmem>>, vector<128x128xf32>,
    } else {
    }
    return
  }
  func.func @transform_0(%arg0: i32, %arg1: i32) -> (i32, i32) {
    %c0_i32 = arith.constant 0 : i32
    %c0_i32_0 = arith.constant 0 : i32
    return %arg1, %c0_i32 : i32, i32
  }
  func.func @transform_1(%arg0: i32, %arg1: i32) -> (i32, i32, i32) {
    %c0_i32 = arith.constant 0 : i32
    %c0_i32_0 = arith.constant 0 : i32
    %c0_i32_1 = arith.constant 0 : i32
    %c0_i32_2 = arith.constant 0 : i32
    return %c0_i32, %c0_i32_0, %c0_i32_1 : i32, i32, i32
  }
  func.func @transform_2(%arg0: i32, %arg1: i32) -> (i32, i32, i32) {
    %c0_i32 = arith.constant 0 : i32
    %c0_i32_0 = arith.constant 0 : i32
    return %c0_i32, %arg0, %arg1 : i32, i32, i32
  }
  func.func @transform_3(%arg0: i32, %arg1: i32) -> (i32, i32) {
    %c0_i32 = arith.constant 0 : i32
    %c0_i32_0 = arith.constant 0 : i32
    return %arg0, %c0_i32 : i32, i32
  }
  func.func @transform_4(%arg0: i32, %arg1: i32) -> (i32, i32) {
    %c0_i32 = arith.constant 0 : i32
    %c0_i32_0 = arith.constant 0 : i32
    return %arg0, %c0_i32 : i32, i32
  }
}

</mosaic_0001>

<bundles_post_ra>
// kernel: hetero_gcn_net.3
= control target key start
LH: loop header
LB: loop body
LE: loop exit
PB: predicated region body
PF: predicated region fallthrough
CT: control target
= control target key end

     0   :  { %s1141_s0 = inlined_call_operand.vmem [shape: bf16[128,128], index: 0, kind: input, shape index: {}]   ;;  %s1142_s2 = inlined_call_operand.vmem [shape: s8[2,128,128], index: 2, kind: input, shape index: {}]   ;;  %s1143_s1 = inlined_call_operand.vmem [shape: f32[2,128,128], index: 1, kind: input, shape index: {}]   ;;  %s1144_s3 = inlined_call_operand.vmem [shape: f32[128,1], index: 3, kind: input, shape index: {}]   ;;  %s1145_s4 = inlined_call_operand.vmem [shape: f32[128,128], index: 4, kind: output, shape index: {}]  }
   0x1   :  { %v870_v0 = vld [vmem:[%s1141_s0 + $0x38] sm:$0xff]  ;;  %v869_v1 = vld [vmem:[%s1141_s0 + $0x30] sm:$0xff]  ;;  %v868_v2 = vld [vmem:[%s1141_s0 + $0x28] sm:$0xff] }
   0x2   :  { %177 = vmatpush.bf16.msra.mxu0 %v870_v0  ;;  %320 = vmatpush.bf16.msra.mxu1 %v870_v0  ;;  %v867_v3 = vld [vmem:[%s1141_s0 + $0x20] sm:$0xff]  ;;  %v866_v4 = vld [vmem:[%s1141_s0 + $0x18] sm:$0xff]  ;;  %v865_v5 = vld [vmem:[%s1141_s0 + $0x10] sm:$0xff] }
   0x3   :  { %v85_v6 = vld [vmem:[%s1142_s2] sm:$0xff]  ;;  %v864_v12 = vld [vmem:[%s1141_s0 + $0x8] sm:$0xff]  ;;  %v435_v52 = vld [vmem:[%s1143_s1 + $0x78] sm:$0xff] }
   0x4   :  { %v843_v7 = vld [vmem:[%s1142_s2 + $0x20] sm:$0xff]  ;;  %v89_v8 = vunpack.c.0.s8 %v85_v6  ;;  %v90_v9 = vunpack.c.1.s8 %v85_v6  ;;  %v91_v20 = vunpack.c.2.s8 %v85_v6  ;;  %v92_v21 = vunpack.c.3.s8 %v85_v6  ;;  %v86_v30 = vld [vmem:[%s1142_s2 + $0x8] sm:$0xff]  ;;  %v862_v53 = vld [vmem:[%s1143_s1 + $0xf8] sm:$0xff]  ;;  %436 = vmatpush.msra.mxu2 %v435_v52 }
   0x5   :  { %v280_v10 = vunpack.c.0.s8 %v843_v7  ;;  %v281_v11 = vunpack.c.1.s8 %v843_v7  ;;  %v863_v17 = vld [vmem:[%s1141_s0] sm:$0xff]  ;;  %v282_v22 = vunpack.c.2.s8 %v843_v7  ;;  %v283_v23 = vunpack.c.3.s8 %v843_v7  ;;  %v844_v31 = vld [vmem:[%s1142_s2 + $0x28] sm:$0xff]  ;;  %v87_v54 = vld [vmem:[%s1142_s2 + $0x10] sm:$0xff]  ;;  %566 = vmatpush.msra.mxu3 %v862_v53 }
   0x6   :  { %178 = vmatpush.bf16.msra.mxu0 %v869_v1  ;;  %321 = vmatpush.bf16.msra.mxu1 %v869_v1  ;;  %v105_v13 = vcvt.s32.f32 %v89_v8  ;;  %v106_v14 = vcvt.s32.f32 %v90_v9  ;;  %v107_v24 = vcvt.s32.f32 %v91_v20  ;;  %v108_v25 = vcvt.s32.f32 %v92_v21  ;;  %v845_v55 = vld [vmem:[%s1142_s2 + $0x30] sm:$0xff]  ;;  %v432_v6 = vld [vmem:[%s1143_s1 + $0x60] sm:$0xff]  ;;  %v429_v20 = vld [vmem:[%s1143_s1 + $0x48] sm:$0xff] }
   0x7   :  { %v296_v15 = vcvt.s32.f32 %v280_v10  ;;  %v297_v16 = vcvt.s32.f32 %v281_v11  ;;  %v298_v26 = vcvt.s32.f32 %v282_v22  ;;  %v299_v27 = vcvt.s32.f32 %v283_v23  ;;  %v859_v7 = vld [vmem:[%s1143_s1 + $0xe0] sm:$0xff]  ;;  %v856_v21 = vld [vmem:[%s1143_s1 + $0xc8] sm:$0xff] }
   0x8   :  { %v121_v18 = vpack.c.bf16 %v106_v14, %v105_v13  ;;  %v122_v28 = vpack.c.bf16 %v108_v25, %v107_v24  ;;  %v93_v32 = vunpack.c.0.s8 %v86_v30  ;;  %v94_v33 = vunpack.c.1.s8 %v86_v30  ;;  %v858_v13 = vld [vmem:[%s1143_s1 + $0xd8] sm:$0xff]  ;;  %v430_v14 = vld [vmem:[%s1143_s1 + $0x50] sm:$0xff]  ;;  %v428_v22 = vld [vmem:[%s1143_s1 + $0x40] sm:$0xff] }
   0x9   :  { %v312_v19 = vpack.c.bf16 %v297_v16, %v296_v15  ;;  %v313_v29 = vpack.c.bf16 %v299_v27, %v298_v26  ;;  %v284_v34 = vunpack.c.0.s8 %v844_v31  ;;  %v285_v35 = vunpack.c.1.s8 %v844_v31  ;;  %v857_v15 = vld [vmem:[%s1143_s1 + $0xd0] sm:$0xff]  ;;  %v855_v23 = vld [vmem:[%s1143_s1 + $0xc0] sm:$0xff]  ;;  %v427_v26 = vld [vmem:[%s1143_s1 + $0x38] sm:$0xff] }
   0xa   :  { %179 = vmatpush.bf16.msra.mxu0 %v868_v2  ;;  %322 = vmatpush.bf16.msra.mxu1 %v868_v2  ;;  %v109_v36 = vcvt.s32.f32 %v93_v32  ;;  %v110_v37 = vcvt.s32.f32 %v94_v33  ;;  %v95_v42 = vunpack.c.2.s8 %v86_v30  ;;  %v96_v43 = vunpack.c.3.s8 %v86_v30  ;;  %v434_v2 = vld [vmem:[%s1143_s1 + $0x70] sm:$0xff]  ;;  %v854_v27 = vld [vmem:[%s1143_s1 + $0xb8] sm:$0xff]  ;;  %v425_v30 = vld [vmem:[%s1143_s1 + $0x28] sm:$0xff] }
   0xb   :  { %v300_v38 = vcvt.s32.f32 %v284_v34  ;;  %v301_v39 = vcvt.s32.f32 %v285_v35  ;;  %v286_v44 = vunpack.c.2.s8 %v844_v31  ;;  %v287_v45 = vunpack.c.3.s8 %v844_v31  ;;  %437 = vmatpush.msra.mxu2 %v434_v2  ;;  %v88_v31 = vld [vmem:[%s1142_s2 + $0x18] sm:$0xff]  ;;  %v852_v33 = vld [vmem:[%s1143_s1 + $0xa8] sm:$0xff]  ;;  %v424_v34 = vld [vmem:[%s1143_s1 + $0x20] sm:$0xff] }
   0xc   :  { %v123_v40 = vpack.c.bf16 %v110_v37, %v109_v36  ;;  %v111_v46 = vcvt.s32.f32 %v95_v42  ;;  %v112_v47 = vcvt.s32.f32 %v96_v43  ;;  %v97_v56 = vunpack.c.0.s8 %v87_v54  ;;  %v846_v32 = vld [vmem:[%s1142_s2 + $0x38] sm:$0xff]  ;;  %v851_v35 = vld [vmem:[%s1143_s1 + $0xa0] sm:$0xff]  ;;  %v422_v42 = vld [vmem:[%s1143_s1 + $0x10] sm:$0xff] }
   0xd   :  { %v314_v41 = vpack.c.bf16 %v301_v39, %v300_v38  ;;  %v302_v48 = vcvt.s32.f32 %v286_v44  ;;  %v303_v49 = vcvt.s32.f32 %v287_v45  ;;  %v98_v57 = vunpack.c.1.s8 %v87_v54  ;;  %v849_v43 = vld [vmem:[%s1143_s1 + $0x90] sm:$0xff]  ;;  %v420_v52 = vld [vmem:[%s1143_s1] sm:$0xff]  ;;  %v680_v2 = vld [vmem:[%s1144_s3 + $0x8] sm:$0xff] }
   0xe   :  { %180 = vmatpush.bf16.msra.mxu0 %v867_v3  ;;  %323 = vmatpush.bf16.msra.mxu1 %v867_v3  ;;  %v124_v50 = vpack.c.bf16 %v112_v47, %v111_v46  ;;  %v288_v58 = vunpack.c.0.s8 %v845_v55  ;;  %v289_v59 = vunpack.c.1.s8 %v845_v55  ;;  %v113_v60 = vcvt.s32.f32 %v97_v56  ;;  %v861_v3 = vld [vmem:[%s1143_s1 + $0xf0] sm:$0xff]  ;;  %v847_v53 = vld [vmem:[%s1143_s1 + $0x80] sm:$0xff] }
   0xf   :  { %v315_v51 = vpack.c.bf16 %v303_v49, %v302_v48  ;;  %v114_v61 = vcvt.s32.f32 %v98_v57  ;;  %567 = vmatpush.msra.mxu3 %v861_v3  ;;  %v99_v8 = vunpack.c.2.s8 %v87_v54  ;;  %v100_v9 = vunpack.c.3.s8 %v87_v54  ;;  %v421_v48 = vld [vmem:[%s1143_s1 + $0x8] sm:$0xff] }
  0x10   :  { %v304_v62 = vcvt.s32.f32 %v288_v58  ;;  %v305_v63 = vcvt.s32.f32 %v289_v59  ;;  %v290_v10 = vunpack.c.2.s8 %v845_v55  ;;  %v291_v11 = vunpack.c.3.s8 %v845_v55  ;;  %v848_v49 = vld [vmem:[%s1143_s1 + $0x88] sm:$0xff] }
  0x11   :  { %v125_v0 = vpack.c.bf16 %v114_v61, %v113_v60  ;;  %v115_v16 = vcvt.s32.f32 %v99_v8  ;;  %v101_v36 = vunpack.c.0.s8 %v88_v31  ;;  %v102_v37 = vunpack.c.1.s8 %v88_v31  ;;  %v682_v8 = vld [vmem:[%s1144_s3 + $0x18] sm:$0xff] }
  0x12   :  { %181 = vmatpush.bf16.msra.mxu0 %v866_v4  ;;  %324 = vmatpush.bf16.msra.mxu1 %v866_v4  ;;  %v316_v1 = vpack.c.bf16 %v305_v63, %v304_v62  ;;  %v433_v4 = vld [vmem:[%s1143_s1 + $0x68] sm:$0xff]  ;;  %v292_v38 = vunpack.c.0.s8 %v846_v32  ;;  %v293_v39 = vunpack.c.1.s8 %v846_v32  ;;  %v103_v54 = vunpack.c.2.s8 %v88_v31 }
  0x13   :  { %438 = vmatpush.msra.mxu2 %v433_v4  ;;  %v117_v44 = vcvt.s32.f32 %v101_v36  ;;  %v118_v45 = vcvt.s32.f32 %v102_v37  ;;  %v104_v55 = vunpack.c.3.s8 %v88_v31  ;;  %v294_v56 = vunpack.c.2.s8 %v846_v32 }
  0x14   :  { %v308_v46 = vcvt.s32.f32 %v292_v38  ;;  %v309_v47 = vcvt.s32.f32 %v293_v39  ;;  %v295_v57 = vunpack.c.3.s8 %v846_v32  ;;  %v119_v58 = vcvt.s32.f32 %v103_v54  ;;  %v690_v39 = vld [vmem:[%s1144_s3 + $0x58] sm:$0xff] }
  0x15   :  { %439 = vmatpush.msra.mxu2 %v432_v6  ;;  %v120_v59 = vcvt.s32.f32 %v104_v55  ;;  %v310_v60 = vcvt.s32.f32 %v294_v56 }
  0x16   :  { %182 = vmatpush.bf16.msra.mxu0 %v865_v5  ;;  %325 = vmatpush.bf16.msra.mxu1 %v865_v5  ;;  %v860_v5 = vld [vmem:[%s1143_s1 + $0xe8] sm:$0xff]  ;;  %v311_v61 = vcvt.s32.f32 %v295_v57 }
  0x17   :  { %568 = vmatpush.msra.mxu3 %v860_v5  ;;  %v128_v62 = vpack.c.bf16 %v120_v59, %v119_v58  ;;  %v681_v5 = vld [vmem:[%s1144_s3 + $0x10] sm:$0xff] }
  0x18   :  { %v319_v63 = vpack.c.bf16 %v311_v61, %v310_v60 }
  0x19   :  { %569 = vmatpush.msra.mxu3 %v859_v7 }
  0x1a   :  { %183 = vmatpush.bf16.msra.mxu0 %v864_v12  ;;  %326 = vmatpush.bf16.msra.mxu1 %v864_v12  ;;  %v431_v12 = vld [vmem:[%s1143_s1 + $0x58] sm:$0xff] }
  0x1b   :  { %440 = vmatpush.msra.mxu2 %v431_v12  ;;  %570 = vmatpush.msra.mxu3 %v858_v13 }
  0x1d   :  { %441 = vmatpush.msra.mxu2 %v430_v14  ;;  %571 = vmatpush.msra.mxu3 %v857_v15  ;;  %v685_v15 = vld [vmem:[%s1144_s3 + $0x30] sm:$0xff] }
  0x1e   :  { %184 = vmatpush.bf16.msra.mxu0 %v863_v17  ;;  %327 = vmatpush.bf16.msra.mxu1 %v863_v17  ;;  %v116_v17 = vcvt.s32.f32 %v100_v9 }
  0x1f   :  { %442 = vmatpush.msra.mxu2 %v429_v20  ;;  %572 = vmatpush.msra.mxu3 %v856_v21 }
  0x20   :  { %v126_v24 = vpack.c.bf16 %v116_v17, %v115_v16 }
  0x21   :  { %185 = vmatmul.bf16.vlgmr.msra.gmra.mxu0 %v121_v18  ;;  %328 = vmatmul.bf16.vlgmr.msra.gmra.mxu1 %v312_v19  ;;  %v306_v18 = vcvt.s32.f32 %v290_v10  ;;  %v307_v19 = vcvt.s32.f32 %v291_v11 }
  0x22   :  { %443 = vmatpush.msra.mxu2 %v428_v22  ;;  %573 = vmatpush.msra.mxu3 %v855_v23  ;;  %v684_v22 = vld [vmem:[%s1144_s3 + $0x28] sm:$0xff] }
  0x23   :  { %v317_v25 = vpack.c.bf16 %v307_v19, %v306_v18  ;;  %v683_v18 = vld [vmem:[%s1144_s3 + $0x20] sm:$0xff]  ;;  %v686_v19 = vld [vmem:[%s1144_s3 + $0x38] sm:$0xff]  ;;  %v688_v23 = vld [vmem:[%s1144_s3 + $0x48] sm:$0xff] }
  0x24   :  { %444 = vmatpush.msra.mxu2 %v427_v26  ;;  %574 = vmatpush.msra.mxu3 %v854_v27  ;;  %v691_v26 = vld [vmem:[%s1144_s3 + $0x60] sm:$0xff] }
  0x31   :  { %190 = vmatmul.bf16.gmra.mxu0 %v122_v28  ;;  %333 = vmatmul.bf16.gmra.mxu1 %v313_v29  ;;  %v426_v28 = vld [vmem:[%s1143_s1 + $0x30] sm:$0xff] }
  0x32   :  { %v853_v29 = vld [vmem:[%s1143_s1 + $0xb0] sm:$0xff]  ;;  %445 = vmatpush.msra.mxu2 %v426_v28 }
  0x33   :  { %575 = vmatpush.msra.mxu3 %v853_v29  ;;  %v689_v29 = vld [vmem:[%s1144_s3 + $0x50] sm:$0xff] }
  0x34   :  { %446 = vmatpush.msra.mxu2 %v425_v30  ;;  %v694_v30 = vld [vmem:[%s1144_s3 + $0x78] sm:$0xff] }
  0x35   :  { %576 = vmatpush.msra.mxu3 %v852_v33  ;;  %v687_v33 = vld [vmem:[%s1144_s3 + $0x40] sm:$0xff] }
  0x36   :  { %447 = vmatpush.msra.mxu2 %v424_v34  ;;  %v692_v34 = vld [vmem:[%s1144_s3 + $0x68] sm:$0xff] }
  0x37   :  { %577 = vmatpush.msra.mxu3 %v851_v35 }
  0x41   :  { %195 = vmatmul.bf16.gmra.mxu0 %v123_v40  ;;  %338 = vmatmul.bf16.gmra.mxu1 %v314_v41  ;;  %v423_v40 = vld [vmem:[%s1143_s1 + $0x18] sm:$0xff] }
  0x42   :  { %v850_v41 = vld [vmem:[%s1143_s1 + $0x98] sm:$0xff]  ;;  %448 = vmatpush.msra.mxu2 %v423_v40 }
  0x43   :  { %578 = vmatpush.msra.mxu3 %v850_v41 }
  0x44   :  { %449 = vmatpush.msra.mxu2 %v422_v42  ;;  %v693_v42 = vld [vmem:[%s1144_s3 + $0x70] sm:$0xff] }
  0x45   :  { %579 = vmatpush.msra.mxu3 %v849_v43 }
  0x46   :  { %450 = vmatpush.msra.mxu2 %v421_v48 }
  0x47   :  { %580 = vmatpush.msra.mxu3 %v848_v49 }
  0x48   :  { %451 = vmatpush.msra.mxu2 %v420_v52 }
  0x49   :  { %581 = vmatpush.msra.mxu3 %v847_v53 }
  0x51   :  { %200 = vmatmul.bf16.gmra.mxu0 %v124_v50  ;;  %343 = vmatmul.bf16.gmra.mxu1 %v315_v51  ;;  %v127_v50 = vpack.c.bf16 %v118_v45, %v117_v44  ;;  %v318_v51 = vpack.c.bf16 %v309_v47, %v308_v46 }
  0x61   :  { %205 = vmatmul.bf16.gmra.mxu0 %v125_v0  ;;  %348 = vmatmul.bf16.gmra.mxu1 %v316_v1  ;;  %v679_v0 = vld [vmem:[%s1144_s3] sm:$0xff]  ;;  %v875_v1 = vmov 0  }
  0x62   :  { %872 = vset.pattern.permute.xlu0 %v875_v1  ;;  %873 = vset.pattern.permute.xlu1 %v875_v1 }
  0x63   :  { %697 = vperm.xlu0 %872, %v679_v0   ;;  %874 = vset.pattern.permute.xlu2 %v875_v1 }
  0x64   :  { %707 = vperm.xlu1 %873, %v681_v5   ;;  %717 = vperm.xlu2 %874, %v683_v18  }
  0x6b   :  { %702 = vperm.xlu0 %872, %v680_v2  }
  0x6c   :  { %712 = vperm.xlu1 %873, %v682_v8   ;;  %722 = vperm.xlu2 %874, %v684_v22  }
  0x71   :  { %210 = vmatmul.bf16.gmra.mxu0 %v126_v24  ;;  %353 = vmatmul.bf16.gmra.mxu1 %v317_v25 }
  0x73   :  { %727 = vperm.xlu0 %872, %v685_v15  }
  0x74   :  { %732 = vperm.xlu1 %873, %v686_v19   ;;  %737 = vperm.xlu2 %874, %v687_v33  }
  0x7b   :  { %742 = vperm.xlu0 %872, %v688_v23  }
  0x7c   :  { %747 = vperm.xlu1 %873, %v689_v29   ;;  %752 = vperm.xlu2 %874, %v690_v39  }
  0x81   :  { %215 = vmatmul.bf16.gmra.mxu0 %v127_v50  ;;  %358 = vmatmul.bf16.gmra.mxu1 %v318_v51 }
  0x83   :  { %757 = vperm.xlu0 %872, %v691_v26  }
  0x84   :  { %762 = vperm.xlu1 %873, %v692_v34   ;;  %767 = vperm.xlu2 %874, %v693_v42  }
  0x8b   :  { %772 = vperm.xlu0 %872, %v694_v30  }
  0x91   :  { %220 = vmatmul.bf16.gmra.mxu0 %v128_v62  ;;  %363 = vmatmul.bf16.gmra.mxu1 %v319_v63 }
  0x9e   :  { %v186_v3 = vpop.f32.mrf.mxu0  ;;  %v329_v4 = vpop.f32.mrf.mxu1 }
  0x9f   :  { %452 = vmatmul.f32.vlgmr.msra.gmra.mxu2 %v186_v3  ;;  %582 = vmatmul.f32.vlgmr.msra.gmra.mxu3 %v329_v4 }
  0xa6   :  { %v188_v6 = vpop.f32.mrf.mxu0  ;;  %v331_v7 = vpop.f32.mrf.mxu1 }
  0xa7   :  { %455 = vmatmul.f32.gmra.mxu2 %v188_v6  ;;  %585 = vmatmul.f32.gmra.mxu3 %v331_v7 }
  0xae   :  { %v191_v9 = vpop.f32.mrf.mxu0  ;;  %v334_v10 = vpop.f32.mrf.mxu1 }
  0xaf   :  { %458 = vmatmul.f32.gmra.mxu2 %v191_v9  ;;  %588 = vmatmul.f32.gmra.mxu3 %v334_v10 }
  0xb6   :  { %v193_v11 = vpop.f32.mrf.mxu0  ;;  %v336_v12 = vpop.f32.mrf.mxu1 }
  0xb7   :  { %461 = vmatmul.f32.gmra.mxu2 %v193_v11  ;;  %591 = vmatmul.f32.gmra.mxu3 %v336_v12 }
  0xbe   :  { %v196_v13 = vpop.f32.mrf.mxu0  ;;  %v339_v14 = vpop.f32.mrf.mxu1 }
  0xbf   :  { %464 = vmatmul.f32.gmra.mxu2 %v196_v13  ;;  %594 = vmatmul.f32.gmra.mxu3 %v339_v14  ;;  %v718_v5 = vpop.permute.xlu2 %717 }
  0xc6   :  { %v198_v16 = vpop.f32.mrf.mxu0  ;;  %v341_v17 = vpop.f32.mrf.mxu1 }
  0xc7   :  { %467 = vmatmul.f32.gmra.mxu2 %v198_v16  ;;  %597 = vmatmul.f32.gmra.mxu3 %v341_v17  ;;  %v723_v10 = vpop.permute.xlu2 %722 }
  0xce   :  { %v201_v20 = vpop.f32.mrf.mxu0  ;;  %v344_v21 = vpop.f32.mrf.mxu1 }
  0xcf   :  { %470 = vmatmul.f32.gmra.mxu2 %v201_v20  ;;  %600 = vmatmul.f32.gmra.mxu3 %v344_v21 }
  0xd5   :  { %v698_v49 = vpop.permute.xlu0 %697 }
  0xd6   :  { %v203_v24 = vpop.f32.mrf.mxu0  ;;  %v346_v25 = vpop.f32.mrf.mxu1 }
  0xd7   :  { %473 = vmatmul.f32.gmra.mxu2 %v203_v24  ;;  %603 = vmatmul.f32.gmra.mxu3 %v346_v25  ;;  %v708_v59 = vpop.permute.xlu1 %707  ;;  %v738_v25 = vpop.permute.xlu2 %737 }
  0xdd   :  { %v703_v54 = vpop.permute.xlu0 %702 }
  0xde   :  { %v206_v27 = vpop.f32.mrf.mxu0  ;;  %v349_v28 = vpop.f32.mrf.mxu1 }
  0xdf   :  { %476 = vmatmul.f32.gmra.mxu2 %v206_v27  ;;  %606 = vmatmul.f32.gmra.mxu3 %v349_v28  ;;  %v713_v0 = vpop.permute.xlu1 %712 }
  0xe5   :  { %v728_v15 = vpop.permute.xlu0 %727 }
  0xe6   :  { %v208_v31 = vpop.f32.mrf.mxu0  ;;  %v351_v32 = vpop.f32.mrf.mxu1 }
  0xe7   :  { %479 = vmatmul.f32.gmra.mxu2 %v208_v31  ;;  %609 = vmatmul.f32.gmra.mxu3 %v351_v32  ;;  %v733_v20 = vpop.permute.xlu1 %732 }
  0xed   :  { %v743_v33 = vpop.permute.xlu0 %742 }
  0xee   :  { %v211_v35 = vpop.f32.mrf.mxu0  ;;  %v354_v36 = vpop.f32.mrf.mxu1 }
  0xef   :  { %482 = vmatmul.f32.gmra.mxu2 %v211_v35  ;;  %612 = vmatmul.f32.gmra.mxu3 %v354_v36  ;;  %v748_v35 = vpop.permute.xlu1 %747 }
  0xf6   :  { %v213_v37 = vpop.f32.mrf.mxu0  ;;  %v356_v38 = vpop.f32.mrf.mxu1 }
  0xf7   :  { %485 = vmatmul.f32.gmra.mxu2 %v213_v37  ;;  %615 = vmatmul.f32.gmra.mxu3 %v356_v38 }
  0xfe   :  { %v216_v40 = vpop.f32.mrf.mxu0  ;;  %v359_v41 = vpop.f32.mrf.mxu1 }
  0xff   :  { %488 = vmatmul.f32.gmra.mxu2 %v216_v40  ;;  %618 = vmatmul.f32.gmra.mxu3 %v359_v41 }
 0x106   :  { %v218_v43 = vpop.f32.mrf.mxu0  ;;  %v361_v44 = vpop.f32.mrf.mxu1 }
 0x107   :  { %491 = vmatmul.f32.gmra.mxu2 %v218_v43  ;;  %621 = vmatmul.f32.gmra.mxu3 %v361_v44  ;;  %v753_v43 = vpop.permute.xlu2 %752 }
 0x10e   :  { %v221_v45 = vpop.f32.mrf.mxu0  ;;  %v364_v46 = vpop.f32.mrf.mxu1 }
 0x10f   :  { %494 = vmatmul.f32.gmra.mxu2 %v221_v45  ;;  %624 = vmatmul.f32.gmra.mxu3 %v364_v46 }
 0x116   :  { %v223_v47 = vpop.f32.mrf.mxu0  ;;  %v366_v48 = vpop.f32.mrf.mxu1 }
 0x117   :  { %497 = vmatmul.f32.gmra.mxu2 %v223_v47  ;;  %627 = vmatmul.f32.gmra.mxu3 %v366_v48  ;;  %v758_v48 = vpop.permute.xlu0 %757 }
 0x122   :  { %v453_v50 = vpop.f32.mrf.mxu2  ;;  %v583_v51 = vpop.f32.mrf.mxu3 }
 0x123   :  { %v631_v52 = vadd.f32 %v583_v51, %v453_v50 }
 0x125   :  { %v775_v53 = vmul.f32 %v698_v49, %v631_v52 }
 0x127   :  { %791 = vst [vmem:[%s1145_s4] sm:$0xff] %v775_v53  ;;  %v763_v53 = vpop.permute.xlu1 %762 }
 0x12a   :  { %v456_v55 = vpop.f32.mrf.mxu2  ;;  %v586_v56 = vpop.f32.mrf.mxu3 }
 0x12b   :  { %v632_v57 = vadd.f32 %v586_v56, %v456_v55 }
 0x12d   :  { %v776_v58 = vmul.f32 %v703_v54, %v632_v57 }
 0x12f   :  { %792 = vst [vmem:[%s1145_s4 + $0x8] sm:$0xff] %v776_v58  ;;  %v768_v58 = vpop.permute.xlu2 %767 }
 0x132   :  { %v459_v60 = vpop.f32.mrf.mxu2  ;;  %v589_v61 = vpop.f32.mrf.mxu3 }
 0x133   :  { %v633_v62 = vadd.f32 %v589_v61, %v459_v60 }
 0x135   :  { %v777_v63 = vmul.f32 %v708_v59, %v633_v62 }
 0x137   :  { %793 = vst [vmem:[%s1145_s4 + $0x10] sm:$0xff] %v777_v63  ;;  %v773_v63 = vpop.permute.xlu0 %772 }
 0x13a   :  { %v462_v1 = vpop.f32.mrf.mxu2  ;;  %v592_v2 = vpop.f32.mrf.mxu3 }
 0x13b   :  { %v634_v3 = vadd.f32 %v592_v2, %v462_v1 }
 0x13d   :  { %v778_v4 = vmul.f32 %v713_v0, %v634_v3 }
 0x13f   :  { %794 = vst [vmem:[%s1145_s4 + $0x18] sm:$0xff] %v778_v4 }
 0x142   :  { %v465_v6 = vpop.f32.mrf.mxu2  ;;  %v595_v7 = vpop.f32.mrf.mxu3 }
 0x143   :  { %v635_v8 = vadd.f32 %v595_v7, %v465_v6 }
 0x145   :  { %v779_v9 = vmul.f32 %v718_v5, %v635_v8 }
 0x147   :  { %795 = vst [vmem:[%s1145_s4 + $0x20] sm:$0xff] %v779_v9 }
 0x14a   :  { %v468_v11 = vpop.f32.mrf.mxu2  ;;  %v598_v12 = vpop.f32.mrf.mxu3 }
 0x14b   :  { %v636_v13 = vadd.f32 %v598_v12, %v468_v11 }
 0x14d   :  { %v780_v14 = vmul.f32 %v723_v10, %v636_v13 }
 0x14f   :  { %796 = vst [vmem:[%s1145_s4 + $0x28] sm:$0xff] %v780_v14 }
 0x152   :  { %v471_v16 = vpop.f32.mrf.mxu2  ;;  %v601_v17 = vpop.f32.mrf.mxu3 }
 0x153   :  { %v637_v18 = vadd.f32 %v601_v17, %v471_v16 }
 0x155   :  { %v781_v19 = vmul.f32 %v728_v15, %v637_v18 }
 0x157   :  { %797 = vst [vmem:[%s1145_s4 + $0x30] sm:$0xff] %v781_v19 }
 0x15a   :  { %v474_v21 = vpop.f32.mrf.mxu2  ;;  %v604_v22 = vpop.f32.mrf.mxu3 }
 0x15b   :  { %v638_v23 = vadd.f32 %v604_v22, %v474_v21 }
 0x15d   :  { %v782_v24 = vmul.f32 %v733_v20, %v638_v23 }
 0x15f   :  { %798 = vst [vmem:[%s1145_s4 + $0x38] sm:$0xff] %v782_v24 }
 0x162   :  { %v477_v26 = vpop.f32.mrf.mxu2  ;;  %v607_v27 = vpop.f32.mrf.mxu3 }
 0x163   :  { %v639_v28 = vadd.f32 %v607_v27, %v477_v26 }
 0x165   :  { %v783_v29 = vmul.f32 %v738_v25, %v639_v28 }
 0x167   :  { %799 = vst [vmem:[%s1145_s4 + $0x40] sm:$0xff] %v783_v29 }
 0x16a   :  { %v480_v30 = vpop.f32.mrf.mxu2  ;;  %v610_v31 = vpop.f32.mrf.mxu3 }
 0x16b   :  { %v640_v32 = vadd.f32 %v610_v31, %v480_v30 }
 0x16d   :  { %v784_v34 = vmul.f32 %v743_v33, %v640_v32 }
 0x16f   :  { %800 = vst [vmem:[%s1145_s4 + $0x48] sm:$0xff] %v784_v34 }
 0x172   :  { %v483_v36 = vpop.f32.mrf.mxu2  ;;  %v613_v37 = vpop.f32.mrf.mxu3 }
 0x173   :  { %v641_v38 = vadd.f32 %v613_v37, %v483_v36 }
 0x175   :  { %v785_v39 = vmul.f32 %v748_v35, %v641_v38 }
 0x177   :  { %801 = vst [vmem:[%s1145_s4 + $0x50] sm:$0xff] %v785_v39 }
 0x17a   :  { %v486_v40 = vpop.f32.mrf.mxu2  ;;  %v616_v41 = vpop.f32.mrf.mxu3 }
 0x17b   :  { %v642_v42 = vadd.f32 %v616_v41, %v486_v40 }
 0x17d   :  { %v786_v44 = vmul.f32 %v753_v43, %v642_v42 }
 0x17f   :  { %802 = vst [vmem:[%s1145_s4 + $0x58] sm:$0xff] %v786_v44 }
 0x182   :  { %v489_v45 = vpop.f32.mrf.mxu2  ;;  %v619_v46 = vpop.f32.mrf.mxu3 }
 0x183   :  { %v643_v47 = vadd.f32 %v619_v46, %v489_v45 }
 0x185   :  { %v787_v49 = vmul.f32 %v758_v48, %v643_v47 }
 0x187   :  { %803 = vst [vmem:[%s1145_s4 + $0x60] sm:$0xff] %v787_v49 }
 0x18a   :  { %v492_v50 = vpop.f32.mrf.mxu2  ;;  %v622_v51 = vpop.f32.mrf.mxu3 }
 0x18b   :  { %v644_v52 = vadd.f32 %v622_v51, %v492_v50 }
 0x18d   :  { %v788_v54 = vmul.f32 %v763_v53, %v644_v52 }
 0x18f   :  { %804 = vst [vmem:[%s1145_s4 + $0x68] sm:$0xff] %v788_v54 }
 0x192   :  { %v495_v55 = vpop.f32.mrf.mxu2  ;;  %v625_v56 = vpop.f32.mrf.mxu3 }
 0x193   :  { %v645_v57 = vadd.f32 %v625_v56, %v495_v55 }
 0x195   :  { %v789_v59 = vmul.f32 %v768_v58, %v645_v57 }
 0x197   :  { %805 = vst [vmem:[%s1145_s4 + $0x70] sm:$0xff] %v789_v59 }
 0x19a   :  { %v498_v60 = vpop.f32.mrf.mxu2  ;;  %v628_v61 = vpop.f32.mrf.mxu3 }
 0x19b   :  { %v646_v62 = vadd.f32 %v628_v61, %v498_v60 }
 0x19d   :  { %v790_v0 = vmul.f32 %v773_v63, %v646_v62 }
 0x19f   :  { %806 = vst [vmem:[%s1145_s4 + $0x78] sm:$0xff] %v790_v0 }

// kernel: hetero_gcn_net.2
= control target key start
LH: loop header
LB: loop body
LE: loop exit
PB: predicated region body
PF: predicated region fallthrough
CT: control target
= control target key end

     0   :  { %9 = vsyncpa [#allocation4], 0  ;;  %s1315_s0 = inlined_call_operand.vmem [shape: bf16[128,8], index: 0, kind: input, shape index: {}]   ;;  %s1316_s1 = inlined_call_operand.hbm [shape: f32[2,8,128], index: 1, kind: input, shape index: {}]   ;;  %s1317_s2 = inlined_call_operand.hbm [shape: s8[2,128,128], index: 2, kind: input, shape index: {}]   ;;  %s1318_s3 = inlined_call_operand.vmem [shape: f32[128,1], index: 3, kind: input, shape index: {}]   ;;  %s1319_s4 = inlined_call_operand.vmem [shape: f32[128,128], index: 4, kind: output, shape index: {}]  }
   0x1   :  { %s17_s17 = sshll.u32 %s1316_s1, 4  ;;  %s18_s17 = int_to_ptr.hbm [resolvable:$true] %s17_s17 }
   0x2   :  { %10 = vsyncpa [#allocation6], 0  ;;  %s1062_s18 = smov [#allocation3]   ;;  %s30_s22 = sshll.u32 %s1317_s2, 4  ;;  %s31_s22 = int_to_ptr.hbm [resolvable:$true] %s30_s22 }
   0x3   :  { %s19_s19 = sshll.u32 %s1062_s18, 4  ;;  %s1063_s23 = smov 128   ;;  %s20_s19 = int_to_ptr.vmem [resolvable:$true] %s19_s19 }
   0x4   :  { %s1064_s24 = smov 8   ;;  %s1065_s25 = smov [#allocation5]  }
   0x5   :  { %25 = dma.hbm_to_vmem [thread:$0]  %s18_s17, 256, %s20_s19, [#allocation4], %s1063_s23, %s1063_s23, %s1064_s24  }
   0x6   :  { %s32_s26 = sshll.u32 %s1065_s25, 4  ;;  %s33_s26 = int_to_ptr.vmem [resolvable:$true] %s32_s26 }
   0x7   :  { %38 = dma.hbm_to_vmem [thread:$0]  %s31_s22, 1024, %s33_s26, [#allocation6], %s1063_s23, %s1063_s23, %s1064_s24  }
   0x8   :  { %1058 = dma.done.wait [#allocation4], 256  }
   0x9   :  { %1059 = vsyncadd [#allocation4], 4294967040 }
   0xa   :  { %1060 = dma.done.wait [#allocation6], 1024  }
   0xb   :  { %1061 = vsyncadd [#allocation6], 4294966272  ;;  %v1000_v0 = vld [vmem:[%s1315_s0 + $0x38] sm:$0xff]  ;;  %v999_v1 = vld [vmem:[%s1315_s0 + $0x30] sm:$0xff]  ;;  %vm53_vm0 = vcmask 64512  }
   0xc   :  { %210 = vmatpush.bf16.msra.mxu0 %v1000_v0  ;;  %354 = vmatpush.bf16.msra.mxu1 %v1000_v0  ;;  %v998_v2 = vld [vmem:[%s1315_s0 + $0x28] sm:$0xff]  ;;  %v997_v3 = vld [vmem:[%s1315_s0 + $0x20] sm:$0xff]  ;;  %v996_v4 = vld [vmem:[%s1315_s0 + $0x18] sm:$0xff] }
   0xd   :  { %v995_v5 = vld [vmem:[%s1315_s0 + $0x10] sm:$0xff]  ;;  %v994_v12 = vld [vmem:[%s1315_s0 + $0x8] sm:$0xff]  ;;  %v993_v17 = vld [vmem:[%s1315_s0] sm:$0xff] }
   0xe   :  { %v118_v6 = vld [vmem:[#allocation5] sm:$0xff]  ;;  %v119_v30 = vld [vmem:[#allocation5 + $0x8] sm:$0xff]  ;;  %v120_v52 = vld [vmem:[#allocation5 + $0x10] sm:$0xff] }
   0xf   :  { %v310_v7 = vld [vmem:[#allocation5 + $0x20] sm:$0xff]  ;;  %v122_v8 = vunpack.c.0.s8 %v118_v6  ;;  %v123_v9 = vunpack.c.1.s8 %v118_v6  ;;  %v124_v20 = vunpack.c.2.s8 %v118_v6  ;;  %v125_v21 = vunpack.c.3.s8 %v118_v6  ;;  %v311_v31 = vld [vmem:[#allocation5 + $0x28] sm:$0xff]  ;;  %v312_v53 = vld [vmem:[#allocation5 + $0x30] sm:$0xff] }
  0x10   :  { %211 = vmatpush.bf16.msra.mxu0 %v999_v1  ;;  %355 = vmatpush.bf16.msra.mxu1 %v999_v1  ;;  %v314_v10 = vunpack.c.0.s8 %v310_v7  ;;  %v315_v11 = vunpack.c.1.s8 %v310_v7  ;;  %v316_v22 = vunpack.c.2.s8 %v310_v7  ;;  %v317_v23 = vunpack.c.3.s8 %v310_v7 }
  0x11   :  { %v138_v13 = vcvt.s32.f32 %v122_v8  ;;  %v139_v14 = vcvt.s32.f32 %v123_v9  ;;  %v140_v24 = vcvt.s32.f32 %v124_v20  ;;  %v141_v25 = vcvt.s32.f32 %v125_v21 }
  0x12   :  { %v330_v15 = vcvt.s32.f32 %v314_v10  ;;  %v331_v16 = vcvt.s32.f32 %v315_v11  ;;  %v332_v26 = vcvt.s32.f32 %v316_v22  ;;  %v333_v27 = vcvt.s32.f32 %v317_v23  ;;  %v121_v10 = vld [vmem:[#allocation5 + $0x18] sm:$0xff] }
  0x13   :  { %v154_v18 = vpack.c.bf16 %v139_v14, %v138_v13  ;;  %v155_v28 = vpack.c.bf16 %v141_v25, %v140_v24  ;;  %v126_v32 = vunpack.c.0.s8 %v119_v30  ;;  %v127_v33 = vunpack.c.1.s8 %v119_v30  ;;  %v313_v11 = vld [vmem:[#allocation5 + $0x38] sm:$0xff] }
  0x14   :  { %212 = vmatpush.bf16.msra.mxu0 %v998_v2  ;;  %356 = vmatpush.bf16.msra.mxu1 %v998_v2  ;;  %v346_v19 = vpack.c.bf16 %v331_v16, %v330_v15  ;;  %v347_v29 = vpack.c.bf16 %v333_v27, %v332_v26  ;;  %v318_v34 = vunpack.c.0.s8 %v311_v31  ;;  %v319_v35 = vunpack.c.1.s8 %v311_v31  ;;  %v454_v27 = vld [vmem:[#allocation3] sm:$0xff] }
  0x15   :  { %v142_v36 = vcvt.s32.f32 %v126_v32  ;;  %v143_v37 = vcvt.s32.f32 %v127_v33  ;;  %v128_v42 = vunpack.c.2.s8 %v119_v30  ;;  %v129_v43 = vunpack.c.3.s8 %v119_v30  ;;  %518 = vmatpush.msra.mxu2 %v454_v27 }
  0x16   :  { %v334_v38 = vcvt.s32.f32 %v318_v34  ;;  %v335_v39 = vcvt.s32.f32 %v319_v35  ;;  %v320_v44 = vunpack.c.2.s8 %v311_v31  ;;  %v321_v45 = vunpack.c.3.s8 %v311_v31 }
  0x17   :  { %v156_v40 = vpack.c.bf16 %v143_v37, %v142_v36  ;;  %v144_v46 = vcvt.s32.f32 %v128_v42  ;;  %v145_v47 = vcvt.s32.f32 %v129_v43  ;;  %v130_v54 = vunpack.c.0.s8 %v120_v52 }
  0x18   :  { %213 = vmatpush.bf16.msra.mxu0 %v997_v3  ;;  %357 = vmatpush.bf16.msra.mxu1 %v997_v3  ;;  %v348_v41 = vpack.c.bf16 %v335_v39, %v334_v38  ;;  %v336_v48 = vcvt.s32.f32 %v320_v44  ;;  %v337_v49 = vcvt.s32.f32 %v321_v45  ;;  %v131_v55 = vunpack.c.1.s8 %v120_v52  ;;  %v779_v38 = vld [vmem:[%s1318_s3] sm:$0xff]  ;;  %v780_v45 = vld [vmem:[%s1318_s3 + $0x8] sm:$0xff] }
  0x19   :  { %v157_v50 = vpack.c.bf16 %v145_v47, %v144_v46  ;;  %v322_v56 = vunpack.c.0.s8 %v312_v53  ;;  %v323_v57 = vunpack.c.1.s8 %v312_v53  ;;  %v146_v58 = vcvt.s32.f32 %v130_v54  ;;  %v781_v54 = vld [vmem:[%s1318_s3 + $0x10] sm:$0xff] }
  0x1a   :  { %v349_v51 = vpack.c.bf16 %v337_v49, %v336_v48  ;;  %v147_v59 = vcvt.s32.f32 %v131_v55  ;;  %v132_v0 = vunpack.c.2.s8 %v120_v52  ;;  %v133_v1 = vunpack.c.3.s8 %v120_v52 }
  0x1b   :  { %v338_v60 = vcvt.s32.f32 %v322_v56  ;;  %v339_v61 = vcvt.s32.f32 %v323_v57  ;;  %v324_v2 = vunpack.c.2.s8 %v312_v53  ;;  %v325_v3 = vunpack.c.3.s8 %v312_v53 }
  0x1c   :  { %214 = vmatpush.bf16.msra.mxu0 %v996_v4  ;;  %358 = vmatpush.bf16.msra.mxu1 %v996_v4  ;;  %v158_v62 = vpack.c.bf16 %v147_v59, %v146_v58  ;;  %v148_v4 = vcvt.s32.f32 %v132_v0  ;;  %v134_v13 = vunpack.c.0.s8 %v121_v10  ;;  %v135_v14 = vunpack.c.1.s8 %v121_v10 }
  0x1d   :  { %v350_v63 = vpack.c.bf16 %v339_v61, %v338_v60  ;;  %v340_v6 = vcvt.s32.f32 %v324_v2  ;;  %v341_v7 = vcvt.s32.f32 %v325_v3  ;;  %v326_v15 = vunpack.c.0.s8 %v313_v11 }
  0x1e   :  { %v327_v16 = vunpack.c.1.s8 %v313_v11  ;;  %v136_v23 = vunpack.c.2.s8 %v121_v10  ;;  %v137_v24 = vunpack.c.3.s8 %v121_v10  ;;  %v328_v25 = vunpack.c.2.s8 %v313_v11 }
  0x1f   :  { %v351_v9 = vpack.c.bf16 %v341_v7, %v340_v6  ;;  %v329_v26 = vunpack.c.3.s8 %v313_v11  ;;  %v1067_v37 = vmov 0  }
  0x20   :  { %215 = vmatpush.bf16.msra.mxu0 %v995_v5  ;;  %359 = vmatpush.bf16.msra.mxu1 %v995_v5  ;;  %v149_v5 = vcvt.s32.f32 %v133_v1  ;;  %v343_v20 = vcvt.s32.f32 %v327_v16  ;;  %v153_v30 = vcvt.s32.f32 %v137_v24  ;;  %v344_v31 = vcvt.s32.f32 %v328_v25  ;;  %v785_v24 = vld [vmem:[%s1318_s3 + $0x30] sm:$0xff] }
  0x21   :  { %v345_v32 = vcvt.s32.f32 %v329_v26  ;;  %1007 = vset.pattern.permute.xlu0 %v1067_v37  ;;  %1008 = vset.pattern.permute.xlu1 %v1067_v37 }
  0x22   :  { %v159_v8 = vpack.c.bf16 %v149_v5, %v148_v4  ;;  %797 = vperm.xlu0 %1007, %v779_v38   ;;  %1009 = vset.pattern.permute.xlu2 %v1067_v37 }
  0x23   :  { %v353_v34 = vpack.c.bf16 %v345_v32, %v344_v31  ;;  %807 = vperm.xlu1 %1008, %v781_v54  }
  0x24   :  { %216 = vmatpush.bf16.msra.mxu0 %v994_v12  ;;  %360 = vmatpush.bf16.msra.mxu1 %v994_v12  ;;  %v1066_v12 = vmov 0.0  }
  0x25   :  { %54 = vst.msk [vmem:[#allocation2] sm:$0xff] %vm53_vm0, %v1066_v12 }
  0x26   :  { %55 = vst.msk [vmem:[#allocation2 + $0x8] sm:$0xff] %vm53_vm0, %v1066_v12 }
  0x27   :  { %56 = vst.msk [vmem:[#allocation2 + $0x10] sm:$0xff] %vm53_vm0, %v1066_v12 }
  0x28   :  { %217 = vmatpush.bf16.msra.mxu0 %v993_v17  ;;  %361 = vmatpush.bf16.msra.mxu1 %v993_v17  ;;  %57 = vst.msk [vmem:[#allocation2 + $0x18] sm:$0xff] %vm53_vm0, %v1066_v12  ;;  %v150_v17 = vcvt.s32.f32 %v134_v13 }
  0x29   :  { %58 = vst.msk [vmem:[#allocation2 + $0x20] sm:$0xff] %vm53_vm0, %v1066_v12 }
  0x2a   :  { %59 = vst.msk [vmem:[#allocation2 + $0x28] sm:$0xff] %vm53_vm0, %v1066_v12  ;;  %802 = vperm.xlu0 %1007, %v780_v45  }
  0x2b   :  { %218 = vmatmul.bf16.vlgmr.msra.gmra.mxu0 %v154_v18  ;;  %362 = vmatmul.bf16.vlgmr.msra.gmra.mxu1 %v346_v19  ;;  %60 = vst.msk [vmem:[#allocation2 + $0x30] sm:$0xff] %vm53_vm0, %v1066_v12  ;;  %v151_v18 = vcvt.s32.f32 %v135_v14  ;;  %v342_v19 = vcvt.s32.f32 %v326_v15 }
  0x2c   :  { %61 = vst.msk [vmem:[#allocation2 + $0x38] sm:$0xff] %vm53_vm0, %v1066_v12  ;;  %v102_v35 = vld [vmem:[#allocation2] sm:$0xff] }
  0x2d   :  { %62 = vst.msk [vmem:[#allocation2 + $0x40] sm:$0xff] %vm53_vm0, %v1066_v12  ;;  %v160_v21 = vpack.c.bf16 %v151_v18, %v150_v17  ;;  %v352_v22 = vpack.c.bf16 %v343_v20, %v342_v19  ;;  %v103_v43 = vld [vmem:[#allocation2 + $0x8] sm:$0xff] }
  0x2e   :  { %63 = vst.msk [vmem:[#allocation2 + $0x48] sm:$0xff] %vm53_vm0, %v1066_v12  ;;  %v104_v52 = vld [vmem:[#allocation2 + $0x10] sm:$0xff] }
  0x2f   :  { %64 = vst.msk [vmem:[#allocation2 + $0x50] sm:$0xff] %vm53_vm0, %v1066_v12  ;;  %v105_v61 = vld [vmem:[#allocation2 + $0x18] sm:$0xff] }
  0x30   :  { %65 = vst.msk [vmem:[#allocation2 + $0x58] sm:$0xff] %vm53_vm0, %v1066_v12  ;;  %v106_v6 = vld [vmem:[#allocation2 + $0x20] sm:$0xff] }
  0x31   :  { %66 = vst.msk [vmem:[#allocation2 + $0x60] sm:$0xff] %vm53_vm0, %v1066_v12  ;;  %v107_v14 = vld [vmem:[#allocation2 + $0x28] sm:$0xff] }
  0x32   :  { %67 = vst.msk [vmem:[#allocation2 + $0x68] sm:$0xff] %vm53_vm0, %v1066_v12  ;;  %827 = vperm.xlu0 %1007, %v785_v24  }
  0x33   :  { %68 = vst.msk [vmem:[#allocation2 + $0x70] sm:$0xff] %vm53_vm0, %v1066_v12  ;;  %v109_v31 = vld [vmem:[#allocation2 + $0x38] sm:$0xff] }
  0x34   :  { %69 = vst.msk [vmem:[#allocation2 + $0x78] sm:$0xff] %vm53_vm0, %v1066_v12 }
  0x35   :  { %70 = vst.msk [vmem:[#allocation2 + $0x80] sm:$0xff] %vm53_vm0, %v1066_v12 }
  0x36   :  { %71 = vst.msk [vmem:[#allocation2 + $0x88] sm:$0xff] %vm53_vm0, %v1066_v12 }
  0x37   :  { %72 = vst.msk [vmem:[#allocation2 + $0x90] sm:$0xff] %vm53_vm0, %v1066_v12 }
  0x38   :  { %73 = vst.msk [vmem:[#allocation2 + $0x98] sm:$0xff] %vm53_vm0, %v1066_v12 }
  0x39   :  { %74 = vst.msk [vmem:[#allocation2 + $0xa0] sm:$0xff] %vm53_vm0, %v1066_v12  ;;  %v115_v24 = vld [vmem:[#allocation2 + $0x68] sm:$0xff] }
  0x3a   :  { %75 = vst.msk [vmem:[#allocation2 + $0xa8] sm:$0xff] %vm53_vm0, %v1066_v12 }
  0x3b   :  { %223 = vmatmul.bf16.gmra.mxu0 %v155_v28  ;;  %367 = vmatmul.bf16.gmra.mxu1 %v347_v29  ;;  %76 = vst.msk [vmem:[#allocation2 + $0xb0] sm:$0xff] %vm53_vm0, %v1066_v12  ;;  %v617_v28 = vld [vmem:[#allocation3 + $0x8] sm:$0xff]  ;;  %v152_v29 = vcvt.s32.f32 %v136_v23 }
  0x3c   :  { %77 = vst.msk [vmem:[#allocation2 + $0xb8] sm:$0xff] %vm53_vm0, %v1066_v12  ;;  %681 = vmatpush.msra.mxu3 %v617_v28  ;;  %v293_v36 = vld [vmem:[#allocation2 + $0x80] sm:$0xff] }
  0x3d   :  { %78 = vst.msk [vmem:[#allocation2 + $0xc0] sm:$0xff] %vm53_vm0, %v1066_v12  ;;  %v161_v33 = vpack.c.bf16 %v153_v30, %v152_v29  ;;  %v294_v44 = vld [vmem:[#allocation2 + $0x88] sm:$0xff] }
  0x3e   :  { %79 = vst.msk [vmem:[#allocation2 + $0xc8] sm:$0xff] %vm53_vm0, %v1066_v12  ;;  %v295_v53 = vld [vmem:[#allocation2 + $0x90] sm:$0xff] }
  0x3f   :  { %80 = vst.msk [vmem:[#allocation2 + $0xd0] sm:$0xff] %vm53_vm0, %v1066_v12 }
  0x40   :  { %81 = vst.msk [vmem:[#allocation2 + $0xd8] sm:$0xff] %vm53_vm0, %v1066_v12  ;;  %v297_v7 = vld [vmem:[#allocation2 + $0xa0] sm:$0xff] }
  0x41   :  { %82 = vst.msk [vmem:[#allocation2 + $0xe0] sm:$0xff] %vm53_vm0, %v1066_v12  ;;  %v298_v15 = vld [vmem:[#allocation2 + $0xa8] sm:$0xff] }
  0x42   :  { %83 = vst.msk [vmem:[#allocation2 + $0xe8] sm:$0xff] %vm53_vm0, %v1066_v12  ;;  %v299_v23 = vld [vmem:[#allocation2 + $0xb0] sm:$0xff] }
  0x43   :  { %84 = vst.msk [vmem:[#allocation2 + $0xf0] sm:$0xff] %vm53_vm0, %v1066_v12  ;;  %v300_v32 = vld [vmem:[#allocation2 + $0xb8] sm:$0xff] }
  0x44   :  { %85 = vst.msk [vmem:[#allocation2 + $0xf8] sm:$0xff] %vm53_vm0, %v1066_v12 }
  0x4b   :  { %228 = vmatmul.bf16.gmra.mxu0 %v156_v40  ;;  %372 = vmatmul.bf16.gmra.mxu1 %v348_v41 }
  0x5b   :  { %233 = vmatmul.bf16.gmra.mxu0 %v157_v50  ;;  %377 = vmatmul.bf16.gmra.mxu1 %v349_v51 }
  0x6b   :  { %238 = vmatmul.bf16.gmra.mxu0 %v158_v62  ;;  %382 = vmatmul.bf16.gmra.mxu1 %v350_v63  ;;  %v296_v62 = vld [vmem:[#allocation2 + $0x98] sm:$0xff] }
  0x6c   :  { %v782_v63 = vld [vmem:[%s1318_s3 + $0x18] sm:$0xff] }
  0x6d   :  { %812 = vperm.xlu1 %1008, %v782_v63   ;;  %v794_v63 = vld [vmem:[%s1318_s3 + $0x78] sm:$0xff] }
  0x7b   :  { %243 = vmatmul.bf16.gmra.mxu0 %v159_v8  ;;  %387 = vmatmul.bf16.gmra.mxu1 %v351_v9 }
  0x8b   :  { %248 = vmatmul.bf16.gmra.mxu0 %v160_v21  ;;  %392 = vmatmul.bf16.gmra.mxu1 %v352_v22  ;;  %v108_v22 = vld [vmem:[#allocation2 + $0x30] sm:$0xff] }
  0x9b   :  { %253 = vmatmul.bf16.gmra.mxu0 %v161_v33  ;;  %397 = vmatmul.bf16.gmra.mxu1 %v353_v34  ;;  %v783_v33 = vld [vmem:[%s1318_s3 + $0x20] sm:$0xff]  ;;  %v786_v34 = vld [vmem:[%s1318_s3 + $0x38] sm:$0xff] }
  0x9c   :  { %817 = vperm.xlu2 %1009, %v783_v33   ;;  %832 = vperm.xlu1 %1008, %v786_v34   ;;  %v116_v33 = vld [vmem:[#allocation2 + $0x70] sm:$0xff] }
  0x9d   :  { %v307_v34 = vld [vmem:[#allocation2 + $0xf0] sm:$0xff] }
  0xa8   :  { %v219_v39 = vpop.f32.mrf.mxu0  ;;  %v363_v40 = vpop.f32.mrf.mxu1 }
  0xa9   :  { %v259_v41 = vadd.f32 %v219_v39, %v102_v35  ;;  %v403_v42 = vadd.f32 %v363_v40, %v293_v36 }
  0xab   :  { %276 = vst.msk [vmem:[#allocation2] sm:$0xff] %vm53_vm0, %v259_v41  ;;  %v110_v41 = vld [vmem:[#allocation2 + $0x40] sm:$0xff] }
  0xac   :  { %419 = vst.msk [vmem:[#allocation2 + $0x80] sm:$0xff] %vm53_vm0, %v403_v42  ;;  %v301_v42 = vld [vmem:[#allocation2 + $0xc0] sm:$0xff] }
  0xb0   :  { %v221_v46 = vpop.f32.mrf.mxu0  ;;  %v365_v47 = vpop.f32.mrf.mxu1 }
  0xb1   :  { %v260_v48 = vadd.f32 %v221_v46, %v103_v43  ;;  %v404_v49 = vadd.f32 %v365_v47, %v294_v44  ;;  %v784_v43 = vld [vmem:[%s1318_s3 + $0x28] sm:$0xff] }
  0xb2   :  { %v438_v50 = vld [vmem:[#allocation2] sm:$0xff]  ;;  %v788_v44 = vld [vmem:[%s1318_s3 + $0x48] sm:$0xff]  ;;  %822 = vperm.xlu2 %1009, %v784_v43   ;;  %v308_v43 = vld [vmem:[#allocation2 + $0xf8] sm:$0xff] }
  0xb3   :  { %277 = vst.msk [vmem:[#allocation2 + $0x8] sm:$0xff] %vm53_vm0, %v260_v48  ;;  %961 = vmatmul.msk.f32.vlgmr.msra.gmra.mxu2 %vm53_vm0, %v438_v50  ;;  %v600_v51 = vld [vmem:[#allocation2 + $0x80] sm:$0xff]  ;;  %842 = vperm.xlu0 %1007, %v788_v44  }
  0xb4   :  { %420 = vst.msk [vmem:[#allocation2 + $0x88] sm:$0xff] %vm53_vm0, %v404_v49  ;;  %977 = vmatmul.msk.f32.vlgmr.msra.gmra.mxu3 %vm53_vm0, %v600_v51  ;;  %v111_v51 = vld [vmem:[#allocation2 + $0x48] sm:$0xff] }
  0xb8   :  { %v224_v55 = vpop.f32.mrf.mxu0  ;;  %v368_v56 = vpop.f32.mrf.mxu1 }
  0xb9   :  { %v261_v57 = vadd.f32 %v224_v55, %v104_v52  ;;  %v405_v58 = vadd.f32 %v368_v56, %v295_v53  ;;  %v302_v52 = vld [vmem:[#allocation2 + $0xc8] sm:$0xff]  ;;  %v791_v53 = vld [vmem:[%s1318_s3 + $0x60] sm:$0xff] }
  0xba   :  { %v439_v59 = vld [vmem:[#allocation2 + $0x8] sm:$0xff] }
  0xbb   :  { %278 = vst.msk [vmem:[#allocation2 + $0x10] sm:$0xff] %vm53_vm0, %v261_v57  ;;  %962 = vmatmul.msk.f32.gmra.mxu2 %vm53_vm0, %v439_v59  ;;  %v601_v60 = vld [vmem:[#allocation2 + $0x88] sm:$0xff]  ;;  %857 = vperm.xlu0 %1007, %v791_v53  }
  0xbc   :  { %421 = vst.msk [vmem:[#allocation2 + $0x90] sm:$0xff] %vm53_vm0, %v405_v58  ;;  %978 = vmatmul.msk.f32.gmra.mxu3 %vm53_vm0, %v601_v60  ;;  %v112_v60 = vld [vmem:[#allocation2 + $0x50] sm:$0xff] }
  0xc0   :  { %v226_v0 = vpop.f32.mrf.mxu0  ;;  %v370_v1 = vpop.f32.mrf.mxu1 }
  0xc1   :  { %v262_v2 = vadd.f32 %v226_v0, %v105_v61  ;;  %v406_v3 = vadd.f32 %v370_v1, %v296_v62  ;;  %v303_v61 = vld [vmem:[#allocation2 + $0xd0] sm:$0xff] }
  0xc2   :  { %v440_v4 = vld [vmem:[#allocation2 + $0x10] sm:$0xff] }
  0xc3   :  { %279 = vst.msk [vmem:[#allocation2 + $0x18] sm:$0xff] %vm53_vm0, %v262_v2  ;;  %963 = vmatmul.msk.f32.gmra.mxu2 %vm53_vm0, %v440_v4  ;;  %v602_v5 = vld [vmem:[#allocation2 + $0x90] sm:$0xff]  ;;  %872 = vperm.xlu0 %1007, %v794_v63  }
  0xc4   :  { %422 = vst.msk [vmem:[#allocation2 + $0x98] sm:$0xff] %vm53_vm0, %v406_v3  ;;  %979 = vmatmul.msk.f32.gmra.mxu3 %vm53_vm0, %v602_v5  ;;  %v789_v62 = vld [vmem:[%s1318_s3 + $0x50] sm:$0xff] }
  0xc5   :  { %847 = vperm.xlu1 %1008, %v789_v62  }
  0xc8   :  { %v229_v8 = vpop.f32.mrf.mxu0  ;;  %v373_v9 = vpop.f32.mrf.mxu1 }
  0xc9   :  { %v263_v10 = vadd.f32 %v229_v8, %v106_v6  ;;  %v407_v11 = vadd.f32 %v373_v9, %v297_v7  ;;  %v113_v6 = vld [vmem:[#allocation2 + $0x58] sm:$0xff]  ;;  %v787_v8 = vld [vmem:[%s1318_s3 + $0x40] sm:$0xff]  ;;  %v792_v9 = vld [vmem:[%s1318_s3 + $0x68] sm:$0xff] }
  0xca   :  { %v441_v12 = vld [vmem:[#allocation2 + $0x18] sm:$0xff]  ;;  %837 = vperm.xlu2 %1009, %v787_v8  }
  0xcb   :  { %280 = vst.msk [vmem:[#allocation2 + $0x20] sm:$0xff] %vm53_vm0, %v263_v10  ;;  %964 = vmatmul.msk.f32.gmra.mxu2 %vm53_vm0, %v441_v12  ;;  %v603_v13 = vld [vmem:[#allocation2 + $0x98] sm:$0xff] }
  0xcc   :  { %423 = vst.msk [vmem:[#allocation2 + $0xa0] sm:$0xff] %vm53_vm0, %v407_v11  ;;  %980 = vmatmul.msk.f32.gmra.mxu3 %vm53_vm0, %v603_v13  ;;  %v304_v7 = vld [vmem:[#allocation2 + $0xd8] sm:$0xff] }
  0xcd   :  { %862 = vperm.xlu1 %1008, %v792_v9  }
  0xd0   :  { %v231_v16 = vpop.f32.mrf.mxu0  ;;  %v375_v17 = vpop.f32.mrf.mxu1 }
  0xd1   :  { %v264_v18 = vadd.f32 %v231_v16, %v107_v14  ;;  %v408_v19 = vadd.f32 %v375_v17, %v298_v15  ;;  %v114_v16 = vld [vmem:[#allocation2 + $0x60] sm:$0xff] }
  0xd2   :  { %v442_v20 = vld [vmem:[#allocation2 + $0x20] sm:$0xff] }
  0xd3   :  { %281 = vst.msk [vmem:[#allocation2 + $0x28] sm:$0xff] %vm53_vm0, %v264_v18  ;;  %965 = vmatmul.msk.f32.gmra.mxu2 %vm53_vm0, %v442_v20  ;;  %v604_v21 = vld [vmem:[#allocation2 + $0xa0] sm:$0xff] }
  0xd4   :  { %424 = vst.msk [vmem:[#allocation2 + $0xa8] sm:$0xff] %vm53_vm0, %v408_v19  ;;  %981 = vmatmul.msk.f32.gmra.mxu3 %vm53_vm0, %v604_v21  ;;  %v305_v17 = vld [vmem:[#allocation2 + $0xe0] sm:$0xff] }
  0xd8   :  { %v234_v25 = vpop.f32.mrf.mxu0  ;;  %v378_v26 = vpop.f32.mrf.mxu1 }
  0xd9   :  { %v265_v27 = vadd.f32 %v234_v25, %v108_v22  ;;  %v409_v28 = vadd.f32 %v378_v26, %v299_v23  ;;  %v306_v25 = vld [vmem:[#allocation2 + $0xe8] sm:$0xff]  ;;  %v790_v26 = vld [vmem:[%s1318_s3 + $0x58] sm:$0xff] }
  0xda   :  { %v443_v29 = vld [vmem:[#allocation2 + $0x28] sm:$0xff]  ;;  %852 = vperm.xlu2 %1009, %v790_v26  }
  0xdb   :  { %282 = vst.msk [vmem:[#allocation2 + $0x30] sm:$0xff] %vm53_vm0, %v265_v27  ;;  %966 = vmatmul.msk.f32.gmra.mxu2 %vm53_vm0, %v443_v29  ;;  %v605_v30 = vld [vmem:[#allocation2 + $0xa8] sm:$0xff] }
  0xdc   :  { %425 = vst.msk [vmem:[#allocation2 + $0xb0] sm:$0xff] %vm53_vm0, %v409_v28  ;;  %982 = vmatmul.msk.f32.gmra.mxu3 %vm53_vm0, %v605_v30 }
  0xe0   :  { %v236_v35 = vpop.f32.mrf.mxu0  ;;  %v380_v36 = vpop.f32.mrf.mxu1 }
  0xe1   :  { %v266_v37 = vadd.f32 %v236_v35, %v109_v31  ;;  %v410_v38 = vadd.f32 %v380_v36, %v300_v32  ;;  %v793_v35 = vld [vmem:[%s1318_s3 + $0x70] sm:$0xff] }
  0xe2   :  { %v444_v39 = vld [vmem:[#allocation2 + $0x30] sm:$0xff]  ;;  %867 = vperm.xlu2 %1009, %v793_v35  }
  0xe3   :  { %283 = vst.msk [vmem:[#allocation2 + $0x38] sm:$0xff] %vm53_vm0, %v266_v37  ;;  %967 = vmatmul.msk.f32.gmra.mxu2 %vm53_vm0, %v444_v39  ;;  %v606_v40 = vld [vmem:[#allocation2 + $0xb0] sm:$0xff] }
  0xe4   :  { %426 = vst.msk [vmem:[#allocation2 + $0xb8] sm:$0xff] %vm53_vm0, %v410_v38  ;;  %983 = vmatmul.msk.f32.gmra.mxu3 %vm53_vm0, %v606_v40 }
  0xe8   :  { %v239_v45 = vpop.f32.mrf.mxu0  ;;  %v383_v46 = vpop.f32.mrf.mxu1 }
  0xe9   :  { %v267_v47 = vadd.f32 %v239_v45, %v110_v41  ;;  %v411_v48 = vadd.f32 %v383_v46, %v301_v42  ;;  %v117_v42 = vld [vmem:[#allocation2 + $0x78] sm:$0xff] }
  0xea   :  { %v445_v49 = vld [vmem:[#allocation2 + $0x38] sm:$0xff] }
  0xeb   :  { %284 = vst.msk [vmem:[#allocation2 + $0x40] sm:$0xff] %vm53_vm0, %v267_v47  ;;  %968 = vmatmul.msk.f32.gmra.mxu2 %vm53_vm0, %v445_v49  ;;  %v607_v50 = vld [vmem:[#allocation2 + $0xb8] sm:$0xff] }
  0xec   :  { %427 = vst.msk [vmem:[#allocation2 + $0xc0] sm:$0xff] %vm53_vm0, %v411_v48  ;;  %984 = vmatmul.msk.f32.gmra.mxu3 %vm53_vm0, %v607_v50 }
  0xf0   :  { %v241_v54 = vpop.f32.mrf.mxu0  ;;  %v385_v55 = vpop.f32.mrf.mxu1 }
  0xf1   :  { %v268_v56 = vadd.f32 %v241_v54, %v111_v51  ;;  %v412_v57 = vadd.f32 %v385_v55, %v302_v52  ;;  %v798_v52 = vpop.permute.xlu0 %797 }
  0xf2   :  { %v446_v58 = vld [vmem:[#allocation2 + $0x40] sm:$0xff] }
  0xf3   :  { %285 = vst.msk [vmem:[#allocation2 + $0x48] sm:$0xff] %vm53_vm0, %v268_v56  ;;  %969 = vmatmul.msk.f32.gmra.mxu2 %vm53_vm0, %v446_v58  ;;  %v608_v59 = vld [vmem:[#allocation2 + $0xc0] sm:$0xff] }
  0xf4   :  { %428 = vst.msk [vmem:[#allocation2 + $0xc8] sm:$0xff] %vm53_vm0, %v412_v57  ;;  %985 = vmatmul.msk.f32.gmra.mxu3 %vm53_vm0, %v608_v59 }
  0xf8   :  { %v244_v0 = vpop.f32.mrf.mxu0  ;;  %v388_v1 = vpop.f32.mrf.mxu1 }
  0xf9   :  { %v269_v2 = vadd.f32 %v244_v0, %v112_v60  ;;  %v413_v3 = vadd.f32 %v388_v1, %v303_v61  ;;  %v803_v60 = vpop.permute.xlu0 %802  ;;  %v808_v0 = vpop.permute.xlu1 %807 }
  0xfa   :  { %v447_v4 = vld [vmem:[#allocation2 + $0x48] sm:$0xff] }
  0xfb   :  { %286 = vst.msk [vmem:[#allocation2 + $0x50] sm:$0xff] %vm53_vm0, %v269_v2  ;;  %970 = vmatmul.msk.f32.gmra.mxu2 %vm53_vm0, %v447_v4  ;;  %v609_v5 = vld [vmem:[#allocation2 + $0xc8] sm:$0xff] }
  0xfc   :  { %429 = vst.msk [vmem:[#allocation2 + $0xd0] sm:$0xff] %vm53_vm0, %v413_v3  ;;  %986 = vmatmul.msk.f32.gmra.mxu3 %vm53_vm0, %v609_v5 }
 0x100   :  { %v246_v10 = vpop.f32.mrf.mxu0  ;;  %v390_v11 = vpop.f32.mrf.mxu1 }
 0x101   :  { %v270_v12 = vadd.f32 %v246_v10, %v113_v6  ;;  %v414_v13 = vadd.f32 %v390_v11, %v304_v7  ;;  %v813_v8 = vpop.permute.xlu1 %812  ;;  %v828_v26 = vpop.permute.xlu0 %827 }
 0x102   :  { %v448_v14 = vld [vmem:[#allocation2 + $0x50] sm:$0xff] }
 0x103   :  { %287 = vst.msk [vmem:[#allocation2 + $0x58] sm:$0xff] %vm53_vm0, %v270_v12  ;;  %971 = vmatmul.msk.f32.gmra.mxu2 %vm53_vm0, %v448_v14  ;;  %v610_v15 = vld [vmem:[#allocation2 + $0xd0] sm:$0xff]  ;;  %v818_v12 = vpop.permute.xlu2 %817 }
 0x104   :  { %430 = vst.msk [vmem:[#allocation2 + $0xd8] sm:$0xff] %vm53_vm0, %v414_v13  ;;  %987 = vmatmul.msk.f32.gmra.mxu3 %vm53_vm0, %v610_v15 }
 0x108   :  { %v249_v18 = vpop.f32.mrf.mxu0  ;;  %v393_v19 = vpop.f32.mrf.mxu1 }
 0x109   :  { %v271_v20 = vadd.f32 %v249_v18, %v114_v16  ;;  %v415_v21 = vadd.f32 %v393_v19, %v305_v17 }
 0x10a   :  { %v449_v22 = vld [vmem:[#allocation2 + $0x58] sm:$0xff] }
 0x10b   :  { %288 = vst.msk [vmem:[#allocation2 + $0x60] sm:$0xff] %vm53_vm0, %v271_v20  ;;  %972 = vmatmul.msk.f32.gmra.mxu2 %vm53_vm0, %v449_v22  ;;  %v611_v23 = vld [vmem:[#allocation2 + $0xd8] sm:$0xff] }
 0x10c   :  { %431 = vst.msk [vmem:[#allocation2 + $0xe0] sm:$0xff] %vm53_vm0, %v415_v21  ;;  %988 = vmatmul.msk.f32.gmra.mxu3 %vm53_vm0, %v611_v23  ;;  %v823_v20 = vpop.permute.xlu2 %822 }
 0x110   :  { %v251_v27 = vpop.f32.mrf.mxu0  ;;  %v395_v28 = vpop.f32.mrf.mxu1 }
 0x111   :  { %v272_v29 = vadd.f32 %v251_v27, %v115_v24  ;;  %v416_v30 = vadd.f32 %v395_v28, %v306_v25 }
 0x112   :  { %v450_v31 = vld [vmem:[#allocation2 + $0x60] sm:$0xff] }
 0x113   :  { %289 = vst.msk [vmem:[#allocation2 + $0x68] sm:$0xff] %vm53_vm0, %v272_v29  ;;  %973 = vmatmul.msk.f32.gmra.mxu2 %vm53_vm0, %v450_v31  ;;  %v612_v32 = vld [vmem:[#allocation2 + $0xe0] sm:$0xff] }
 0x114   :  { %432 = vst.msk [vmem:[#allocation2 + $0xe8] sm:$0xff] %vm53_vm0, %v416_v30  ;;  %989 = vmatmul.msk.f32.gmra.mxu3 %vm53_vm0, %v612_v32  ;;  %v833_v32 = vpop.permute.xlu1 %832 }
 0x118   :  { %v254_v36 = vpop.f32.mrf.mxu0  ;;  %v398_v37 = vpop.f32.mrf.mxu1 }
 0x119   :  { %v273_v38 = vadd.f32 %v254_v36, %v116_v33  ;;  %v417_v39 = vadd.f32 %v398_v37, %v307_v34 }
 0x11a   :  { %v451_v40 = vld [vmem:[#allocation2 + $0x68] sm:$0xff] }
 0x11b   :  { %290 = vst.msk [vmem:[#allocation2 + $0x70] sm:$0xff] %vm53_vm0, %v273_v38  ;;  %974 = vmatmul.msk.f32.gmra.mxu2 %vm53_vm0, %v451_v40  ;;  %v613_v41 = vld [vmem:[#allocation2 + $0xe8] sm:$0xff] }
 0x11c   :  { %433 = vst.msk [vmem:[#allocation2 + $0xf0] sm:$0xff] %vm53_vm0, %v417_v39  ;;  %990 = vmatmul.msk.f32.gmra.mxu3 %vm53_vm0, %v613_v41 }
 0x120   :  { %v256_v44 = vpop.f32.mrf.mxu0  ;;  %v400_v45 = vpop.f32.mrf.mxu1 }
 0x121   :  { %v274_v46 = vadd.f32 %v256_v44, %v117_v42  ;;  %v418_v47 = vadd.f32 %v400_v45, %v308_v43 }
 0x122   :  { %v452_v48 = vld [vmem:[#allocation2 + $0x70] sm:$0xff] }
 0x123   :  { %291 = vst.msk [vmem:[#allocation2 + $0x78] sm:$0xff] %vm53_vm0, %v274_v46  ;;  %975 = vmatmul.msk.f32.gmra.mxu2 %vm53_vm0, %v452_v48  ;;  %v614_v49 = vld [vmem:[#allocation2 + $0xf0] sm:$0xff] }
 0x124   :  { %434 = vst.msk [vmem:[#allocation2 + $0xf8] sm:$0xff] %vm53_vm0, %v418_v47  ;;  %991 = vmatmul.msk.f32.gmra.mxu3 %vm53_vm0, %v614_v49  ;;  %v838_v38 = vpop.permute.xlu2 %837 }
 0x125   :  { %v843_v45 = vpop.permute.xlu0 %842 }
 0x12a   :  { %v453_v50 = vld [vmem:[#allocation2 + $0x78] sm:$0xff] }
 0x12b   :  { %976 = vmatmul.msk.f32.gmra.mxu2 %vm53_vm0, %v453_v50  ;;  %v615_v51 = vld [vmem:[#allocation2 + $0xf8] sm:$0xff] }
 0x12c   :  { %992 = vmatmul.msk.f32.gmra.mxu3 %vm53_vm0, %v615_v51 }
 0x136   :  { %v520_v53 = vpop.f32.mrf.mxu2 }
 0x137   :  { %v683_v54 = vpop.f32.mrf.mxu3  ;;  %v848_v50 = vpop.permute.xlu1 %847 }
 0x138   :  { %v731_v55 = vadd.f32 %v683_v54, %v520_v53 }
 0x13a   :  { %v875_v56 = vmul.f32 %v798_v52, %v731_v55 }
 0x13c   :  { %v891_v57 = vmax.f32 %v875_v56, 0.0 }
 0x13e   :  { %v523_v58 = vpop.f32.mrf.mxu2  ;;  %907 = vst [vmem:[%s1319_s4] sm:$0xff] %v891_v57  ;;  %v853_v57 = vpop.permute.xlu2 %852 }
 0x13f   :  { %v686_v59 = vpop.f32.mrf.mxu3 }
 0x140   :  { %v732_v61 = vadd.f32 %v686_v59, %v523_v58 }
 0x142   :  { %v876_v62 = vmul.f32 %v803_v60, %v732_v61 }
 0x144   :  { %v892_v63 = vmax.f32 %v876_v62, 0.0 }
 0x146   :  { %v526_v1 = vpop.f32.mrf.mxu2  ;;  %908 = vst [vmem:[%s1319_s4 + $0x8] sm:$0xff] %v892_v63  ;;  %v858_v63 = vpop.permute.xlu0 %857 }
 0x147   :  { %v689_v2 = vpop.f32.mrf.mxu3 }
 0x148   :  { %v733_v3 = vadd.f32 %v689_v2, %v526_v1 }
 0x14a   :  { %v877_v4 = vmul.f32 %v808_v0, %v733_v3 }
 0x14c   :  { %v893_v5 = vmax.f32 %v877_v4, 0.0 }
 0x14e   :  { %v529_v6 = vpop.f32.mrf.mxu2  ;;  %909 = vst [vmem:[%s1319_s4 + $0x10] sm:$0xff] %v893_v5  ;;  %v863_v5 = vpop.permute.xlu1 %862 }
 0x14f   :  { %v692_v7 = vpop.f32.mrf.mxu3 }
 0x150   :  { %v734_v9 = vadd.f32 %v692_v7, %v529_v6 }
 0x152   :  { %v878_v10 = vmul.f32 %v813_v8, %v734_v9 }
 0x154   :  { %v894_v11 = vmax.f32 %v878_v10, 0.0 }
 0x156   :  { %v532_v13 = vpop.f32.mrf.mxu2  ;;  %910 = vst [vmem:[%s1319_s4 + $0x18] sm:$0xff] %v894_v11  ;;  %v868_v11 = vpop.permute.xlu2 %867 }
 0x157   :  { %v695_v14 = vpop.f32.mrf.mxu3 }
 0x158   :  { %v735_v15 = vadd.f32 %v695_v14, %v532_v13 }
 0x15a   :  { %v879_v16 = vmul.f32 %v818_v12, %v735_v15 }
 0x15c   :  { %v895_v17 = vmax.f32 %v879_v16, 0.0 }
 0x15e   :  { %v535_v18 = vpop.f32.mrf.mxu2  ;;  %911 = vst [vmem:[%s1319_s4 + $0x20] sm:$0xff] %v895_v17  ;;  %v873_v17 = vpop.permute.xlu0 %872 }
 0x15f   :  { %v698_v19 = vpop.f32.mrf.mxu3 }
 0x160   :  { %v736_v21 = vadd.f32 %v698_v19, %v535_v18 }
 0x162   :  { %v880_v22 = vmul.f32 %v823_v20, %v736_v21 }
 0x164   :  { %v896_v23 = vmax.f32 %v880_v22, 0.0 }
 0x166   :  { %v538_v24 = vpop.f32.mrf.mxu2  ;;  %912 = vst [vmem:[%s1319_s4 + $0x28] sm:$0xff] %v896_v23 }
 0x167   :  { %v701_v25 = vpop.f32.mrf.mxu3 }
 0x168   :  { %v737_v27 = vadd.f32 %v701_v25, %v538_v24 }
 0x16a   :  { %v881_v28 = vmul.f32 %v828_v26, %v737_v27 }
 0x16c   :  { %v897_v29 = vmax.f32 %v881_v28, 0.0 }
 0x16e   :  { %v541_v30 = vpop.f32.mrf.mxu2  ;;  %913 = vst [vmem:[%s1319_s4 + $0x30] sm:$0xff] %v897_v29 }
 0x16f   :  { %v704_v31 = vpop.f32.mrf.mxu3 }
 0x170   :  { %v738_v33 = vadd.f32 %v704_v31, %v541_v30 }
 0x172   :  { %v882_v34 = vmul.f32 %v833_v32, %v738_v33 }
 0x174   :  { %v898_v35 = vmax.f32 %v882_v34, 0.0 }
 0x176   :  { %v544_v36 = vpop.f32.mrf.mxu2  ;;  %914 = vst [vmem:[%s1319_s4 + $0x38] sm:$0xff] %v898_v35 }
 0x177   :  { %v707_v37 = vpop.f32.mrf.mxu3 }
 0x178   :  { %v739_v39 = vadd.f32 %v707_v37, %v544_v36 }
 0x17a   :  { %v883_v40 = vmul.f32 %v838_v38, %v739_v39 }
 0x17c   :  { %v899_v41 = vmax.f32 %v883_v40, 0.0 }
 0x17e   :  { %v547_v42 = vpop.f32.mrf.mxu2  ;;  %915 = vst [vmem:[%s1319_s4 + $0x40] sm:$0xff] %v899_v41 }
 0x17f   :  { %v710_v43 = vpop.f32.mrf.mxu3 }
 0x180   :  { %v740_v44 = vadd.f32 %v710_v43, %v547_v42 }
 0x182   :  { %v884_v46 = vmul.f32 %v843_v45, %v740_v44 }
 0x184   :  { %v900_v47 = vmax.f32 %v884_v46, 0.0 }
 0x186   :  { %v550_v48 = vpop.f32.mrf.mxu2  ;;  %916 = vst [vmem:[%s1319_s4 + $0x48] sm:$0xff] %v900_v47 }
 0x187   :  { %v713_v49 = vpop.f32.mrf.mxu3 }
 0x188   :  { %v741_v51 = vadd.f32 %v713_v49, %v550_v48 }
 0x18a   :  { %v885_v52 = vmul.f32 %v848_v50, %v741_v51 }
 0x18c   :  { %v901_v53 = vmax.f32 %v885_v52, 0.0 }
 0x18e   :  { %v553_v54 = vpop.f32.mrf.mxu2  ;;  %917 = vst [vmem:[%s1319_s4 + $0x50] sm:$0xff] %v901_v53 }
 0x18f   :  { %v716_v55 = vpop.f32.mrf.mxu3 }
 0x190   :  { %v742_v56 = vadd.f32 %v716_v55, %v553_v54 }
 0x192   :  { %v886_v58 = vmul.f32 %v853_v57, %v742_v56 }
 0x194   :  { %v902_v59 = vmax.f32 %v886_v58, 0.0 }
 0x196   :  { %v556_v60 = vpop.f32.mrf.mxu2  ;;  %918 = vst [vmem:[%s1319_s4 + $0x58] sm:$0xff] %v902_v59 }
 0x197   :  { %v719_v61 = vpop.f32.mrf.mxu3 }
 0x198   :  { %v743_v62 = vadd.f32 %v719_v61, %v556_v60 }
 0x19a   :  { %v887_v0 = vmul.f32 %v858_v63, %v743_v62 }
 0x19c   :  { %v903_v1 = vmax.f32 %v887_v0, 0.0 }
 0x19e   :  { %919 = vst [vmem:[%s1319_s4 + $0x60] sm:$0xff] %v903_v1  ;;  %v559_v2 = vpop.f32.mrf.mxu2 }
 0x19f   :  { %v722_v3 = vpop.f32.mrf.mxu3 }
 0x1a0   :  { %v744_v4 = vadd.f32 %v722_v3, %v559_v2 }
 0x1a2   :  { %v888_v6 = vmul.f32 %v863_v5, %v744_v4 }
 0x1a4   :  { %v904_v7 = vmax.f32 %v888_v6, 0.0 }
 0x1a6   :  { %920 = vst [vmem:[%s1319_s4 + $0x68] sm:$0xff] %v904_v7  ;;  %v562_v8 = vpop.f32.mrf.mxu2 }
 0x1a7   :  { %v725_v9 = vpop.f32.mrf.mxu3 }
 0x1a8   :  { %v745_v10 = vadd.f32 %v725_v9, %v562_v8 }
 0x1aa   :  { %v889_v12 = vmul.f32 %v868_v11, %v745_v10 }
 0x1ac   :  { %v905_v13 = vmax.f32 %v889_v12, 0.0 }
 0x1ae   :  { %921 = vst [vmem:[%s1319_s4 + $0x70] sm:$0xff] %v905_v13  ;;  %v565_v14 = vpop.f32.mrf.mxu2 }
 0x1af   :  { %v728_v15 = vpop.f32.mrf.mxu3 }
 0x1b0   :  { %v746_v16 = vadd.f32 %v728_v15, %v565_v14 }
 0x1b2   :  { %v890_v18 = vmul.f32 %v873_v17, %v746_v16 }
 0x1b4   :  { %v906_v19 = vmax.f32 %v890_v18, 0.0 }
 0x1b6   :  { %922 = vst [vmem:[%s1319_s4 + $0x78] sm:$0xff] %v906_v19 }
 0x1b7   :  { %927 = vsyncpa [#allocation4], 1 }
 0x1b8   :  { %928 = vsyncpa [#allocation6], 1 }

</bundles_post_ra>
